<compile_context>
chip_gen: v7x
topology: tpu7x:2x2x1
jax: 0.10.0
libtpu: 0.0.40
codegen_flags: <defaults>
</compile_context>

<pallas_src>
import functools

import jax
import jax.numpy as jnp
from jax.experimental import pallas as pl
from jax.experimental.pallas import tpu as pltpu


_PARALLEL_ROWS = pltpu.CompilerParams(dimension_semantics=("parallel",))


def _leaky(x, slope=0.01):          # nn.LeakyReLU default negative_slope
    return jnp.where(x > 0, x, slope * x)


def _row_tile(n, max_tile=256):
    # Full array if small; otherwise a sublane-aligned tile (Pallas pads the
    # ragged last block, and ragged rows only affect dropped output rows).
    return n if n <= max_tile else max_tile


# ----------------------------------------------------------------------------
# K1: fused input projections (block-diagonal GEMM) + linear_relu_input.
#   x = LeakyReLU(feat @ Wblk + bblk)        (== concat of the 4 projections)
#   x = LeakyReLU(x @ Win + bin)
# ----------------------------------------------------------------------------
def _front_kernel(feat_ref, wblk_ref, bblk_ref, win_ref, bin_ref, o_ref):
    x = jnp.dot(feat_ref[...], wblk_ref[...],
                preferred_element_type=jnp.float32) + bblk_ref[...]
    x = _leaky(x)
    x = jnp.dot(x, win_ref[...],
                preferred_element_type=jnp.float32) + bin_ref[...]
    o_ref[...] = _leaky(x)


def front(feat, w_blk, b_blk, w_in, b_in):
    N, Ftot = feat.shape
    H = w_in.shape[1]
    tq = _row_tile(N)
    return pl.pallas_call(
        _front_kernel,
        out_shape=jax.ShapeDtypeStruct((N, H), jnp.float32),
        grid=(pl.cdiv(N, tq),),
        in_specs=[
            pl.BlockSpec((tq, Ftot), lambda i: (i, 0)),
            pl.BlockSpec((Ftot, H), lambda i: (0, 0)),
            pl.BlockSpec((1, H), lambda i: (0, 0)),
            pl.BlockSpec((H, H), lambda i: (0, 0)),
            pl.BlockSpec((1, H), lambda i: (0, 0)),
        ],
        out_specs=pl.BlockSpec((tq, H), lambda i: (i, 0)),
        compiler_params=_PARALLEL_ROWS,
    )(feat, w_blk, b_blk.reshape(1, H), w_in, b_in.reshape(1, H))


# ----------------------------------------------------------------------------
# K2: plain GCNConv.   out_rows = (Â_rows @ X) @ W + b
# ----------------------------------------------------------------------------
def _gcn_kernel(adj_ref, x_ref, w_ref, b_ref, o_ref):
    agg = jnp.dot(adj_ref[...], x_ref[...], preferred_element_type=jnp.float32)
    o_ref[...] = jnp.dot(agg, w_ref[...],
                         preferred_element_type=jnp.float32) + b_ref[...]


def gcn(adj, x, w, b):
    N, Fin = x.shape
    Fout = w.shape[1]
    tq = _row_tile(N)
    return pl.pallas_call(
        _gcn_kernel,
        out_shape=jax.ShapeDtypeStruct((N, Fout), jnp.float32),
        grid=(pl.cdiv(N, tq),),
        in_specs=[
            pl.BlockSpec((tq, N), lambda i: (i, 0)),
            pl.BlockSpec((N, Fin), lambda i: (0, 0)),
            pl.BlockSpec((Fin, Fout), lambda i: (0, 0)),
            pl.BlockSpec((1, Fout), lambda i: (0, 0)),
        ],
        out_specs=pl.BlockSpec((tq, Fout), lambda i: (i, 0)),
        compiler_params=_PARALLEL_ROWS,
    )(adj, x, w, b.reshape(1, Fout))


# ----------------------------------------------------------------------------
# K3: GCNConv + fused Linear+LeakyReLU (row-local epilogue).
# ----------------------------------------------------------------------------
def _gcn_linear_kernel(adj_ref, x_ref, wg_ref, bg_ref, wl_ref, bl_ref, o_ref):
    agg = jnp.dot(adj_ref[...], x_ref[...], preferred_element_type=jnp.float32)
    h = jnp.dot(agg, wg_ref[...],
                preferred_element_type=jnp.float32) + bg_ref[...]
    h = jnp.dot(h, wl_ref[...],
                preferred_element_type=jnp.float32) + bl_ref[...]
    o_ref[...] = _leaky(h)


def gcn_linear(adj, x, wg, bg, wl, bl):
    N, Fin = x.shape
    Fmid = wg.shape[1]
    Fout = wl.shape[1]
    tq = _row_tile(N)
    return pl.pallas_call(
        _gcn_linear_kernel,
        out_shape=jax.ShapeDtypeStruct((N, Fout), jnp.float32),
        grid=(pl.cdiv(N, tq),),
        in_specs=[
            pl.BlockSpec((tq, N), lambda i: (i, 0)),
            pl.BlockSpec((N, Fin), lambda i: (0, 0)),
            pl.BlockSpec((Fin, Fmid), lambda i: (0, 0)),
            pl.BlockSpec((1, Fmid), lambda i: (0, 0)),
            pl.BlockSpec((Fmid, Fout), lambda i: (0, 0)),
            pl.BlockSpec((1, Fout), lambda i: (0, 0)),
        ],
        out_specs=pl.BlockSpec((tq, Fout), lambda i: (i, 0)),
        compiler_params=_PARALLEL_ROWS,
    )(adj, x, wg, bg.reshape(1, Fmid), wl, bl.reshape(1, Fout))


# ----------------------------------------------------------------------------
# K4: GCNConv + the whole tail MLP (output2/3/4 + final classifier), all
#     row-local so intermediates never leave VMEM/vregs.
# ----------------------------------------------------------------------------
def _gcn_tail_kernel(adj_ref, x_ref, wg_ref, bg_ref,
                     w2_ref, b2_ref, w3_ref, b3_ref,
                     w4_ref, b4_ref, w5_ref, b5_ref, o_ref):
    agg = jnp.dot(adj_ref[...], x_ref[...], preferred_element_type=jnp.float32)
    h = jnp.dot(agg, wg_ref[...],
                preferred_element_type=jnp.float32) + bg_ref[...]
    h = _leaky(jnp.dot(h, w2_ref[...],
                       preferred_element_type=jnp.float32) + b2_ref[...])
    h = _leaky(jnp.dot(h, w3_ref[...],
                       preferred_element_type=jnp.float32) + b3_ref[...])
    h = _leaky(jnp.dot(h, w4_ref[...],
                       preferred_element_type=jnp.float32) + b4_ref[...])
    o_ref[...] = jnp.dot(h, w5_ref[...],
                         preferred_element_type=jnp.float32) + b5_ref[...]


def gcn_tail(adj, x, wg, bg, w2, b2, w3, b3, w4, b4, w5, b5):
    N, Fin = x.shape
    Fg = wg.shape[1]
    F2, F3, F4, F5 = w2.shape[1], w3.shape[1], w4.shape[1], w5.shape[1]
    tq = _row_tile(N)
    return pl.pallas_call(
        _gcn_tail_kernel,
        out_shape=jax.ShapeDtypeStruct((N, F5), jnp.float32),
        grid=(pl.cdiv(N, tq),),
        in_specs=[
            pl.BlockSpec((tq, N), lambda i: (i, 0)),
            pl.BlockSpec((N, Fin), lambda i: (0, 0)),
            pl.BlockSpec((Fin, Fg), lambda i: (0, 0)),
            pl.BlockSpec((1, Fg), lambda i: (0, 0)),
            pl.BlockSpec((Fg, F2), lambda i: (0, 0)),
            pl.BlockSpec((1, F2), lambda i: (0, 0)),
            pl.BlockSpec((F2, F3), lambda i: (0, 0)),
            pl.BlockSpec((1, F3), lambda i: (0, 0)),
            pl.BlockSpec((F3, F4), lambda i: (0, 0)),
            pl.BlockSpec((1, F4), lambda i: (0, 0)),
            pl.BlockSpec((F4, F5), lambda i: (0, 0)),
            pl.BlockSpec((1, F5), lambda i: (0, 0)),
        ],
        out_specs=pl.BlockSpec((tq, F5), lambda i: (i, 0)),
        compiler_params=_PARALLEL_ROWS,
    )(adj, x, wg, bg.reshape(1, Fg), w2, b2.reshape(1, F2),
      w3, b3.reshape(1, F3), w4, b4.reshape(1, F4), w5, b5.reshape(1, F5))


# ----------------------------------------------------------------------------
# Graph preprocessing: dense symmetric-normalized adjacency (PyG gcn_norm).
#   adj[dst, src] = sum of edge weights, self-loops added for nodes without
#   one, Â = D^-1/2 (A+I) D^-1/2 with D = row-sum (weighted in-degree).
# ----------------------------------------------------------------------------
def build_normalized_adjacency(edge_index, num_nodes):
    src, dst = edge_index
    adj = jnp.zeros((num_nodes, num_nodes), jnp.float32)
    adj = adj.at[dst, src].add(1.0)
    diag = jnp.diagonal(adj)
    adj = adj + jnp.diag(jnp.where(diag > 0, 0.0, 1.0))   # add_remaining_self_loops
    deg = jnp.sum(adj, axis=1)
    dinv = jax.lax.rsqrt(jnp.maximum(deg, 1e-12))
    return adj * dinv[:, None] * dinv[None, :]


# ----------------------------------------------------------------------------
# Parameter initialization (deterministic, synthetic) — mirrors BotGCN layers.
# ----------------------------------------------------------------------------
def init_params(key, hidden, des_size=768, tweet_size=768,
                num_prop_size=5, cat_prop_size=3):
    h4, h2, h8 = hidden // 4, hidden // 2, hidden // 8
    ks = iter(jax.random.split(key, 64))
    p = {}

    def dense(fin, fout):
        w = jax.random.normal(next(ks), (fin, fout), jnp.float32) * 0.05
        b = jax.random.normal(next(ks), (fout,), jnp.float32) * 0.05
        return w, b

    des_w, des_b = dense(des_size, h4)        # linear_relu_des
    tw_w, tw_b = dense(tweet_size, h4)        # linear_relu_tweet
    np_w, np_b = dense(num_prop_size, h4)     # linear_relu_num_prop
    cp_w, cp_b = dense(cat_prop_size, h4)     # linear_relu_cat_prop

    # Block-diagonal stack so the 4 projections + output concat become ONE GEMM.
    ftot = des_size + tweet_size + num_prop_size + cat_prop_size
    wblk = jnp.zeros((ftot, hidden), jnp.float32)
    r = c = 0
    for w in (des_w, tw_w, np_w, cp_w):
        wblk = wblk.at[r:r + w.shape[0], c:c + w.shape[1]].set(w)
        r += w.shape[0]
        c += w.shape[1]
    p["wblk"] = wblk
    p["bblk"] = jnp.concatenate([des_b, tw_b, np_b, cp_b])

    p["in_w"], p["in_b"] = dense(hidden, hidden)      # linear_relu_input
    p["g1_w"], p["g1_b"] = dense(hidden, hidden)      # gcn1
    p["g2_w"], p["g2_b"] = dense(hidden, hidden)      # gcn2
    p["o1_w"], p["o1_b"] = dense(hidden, h2)          # linear_relu_output1
    p["g3_w"], p["g3_b"] = dense(h2, h2)              # gcn3
    p["o2_w"], p["o2_b"] = dense(h2, h2)              # linear_relu_output2
    p["o3_w"], p["o3_b"] = dense(h2, h4)              # linear_relu_output3
    p["o4_w"], p["o4_b"] = dense(h4, h8)              # linear_relu_output4
    p["out_w"], p["out_b"] = dense(h8, 2)             # linear_output2
    # linear_skip1 / linear_skip2 are unused with skip_connection=False.
    return p


# ----------------------------------------------------------------------------
# Forward pass (BotGCN.forward, eval mode, skip_connection=False).
# ----------------------------------------------------------------------------
@jax.jit
def forward(params, des, tweet, num_prop, cat_prop, adj_norm):
    p = params
    feat = jnp.concatenate([des, tweet, num_prop, cat_prop], axis=1)  # layout glue
    # K1: 4 projections + LeakyReLU + concat + linear_relu_input   (dropout=id)
    x = front(feat, p["wblk"], p["bblk"], p["in_w"], p["in_b"])
    # K2: gcn1                                                      (dropout=id)
    x = gcn(adj_norm, x, p["g1_w"], p["g1_b"])
    # K3: gcn2 + linear_relu_output1                                (dropout=id)
    x = gcn_linear(adj_norm, x, p["g2_w"], p["g2_b"], p["o1_w"], p["o1_b"])
    # K4: gcn3 + linear_relu_output2/3/4 + linear_output2           (dropout=id)
    x = gcn_tail(adj_norm, x, p["g3_w"], p["g3_b"],
                 p["o2_w"], p["o2_b"], p["o3_w"], p["o3_b"],
                 p["o4_w"], p["o4_b"], p["out_w"], p["out_b"])
    return x


# Pure-JAX reference (same math, un-fused) for a correctness sanity check.
def forward_ref(params, des, tweet, num_prop, cat_prop, adj_norm):
    p = params
    feat = jnp.concatenate([des, tweet, num_prop, cat_prop], axis=1)
    x = _leaky(feat @ p["wblk"] + p["bblk"])
    x = _leaky(x @ p["in_w"] + p["in_b"])
    x = adj_norm @ x @ p["g1_w"] + p["g1_b"]
    x = adj_norm @ x @ p["g2_w"] + p["g2_b"]
    x = _leaky(x @ p["o1_w"] + p["o1_b"])
    x = adj_norm @ x @ p["g3_w"] + p["g3_b"]
    x = _leaky(x @ p["o2_w"] + p["o2_b"])
    x = _leaky(x @ p["o3_w"] + p["o3_b"])
    x = _leaky(x @ p["o4_w"] + p["o4_b"])
    return x @ p["out_w"] + p["out_b"]


if __name__ == "__main__":
    key = jax.random.PRNGKey(0)
    N = 16            # number of graph nodes
    hidden = 32       # hidden_dim (divisible by 8)

    k_des, k_tw, k_np, k_cp, k_par = jax.random.split(key, 5)
    des = jax.random.normal(k_des, (N, 768), jnp.float32)
    tweet = jax.random.normal(k_tw, (N, 768), jnp.float32)
    num_prop = jax.random.normal(k_np, (N, 5), jnp.float32)
    cat_prop = jax.random.normal(k_cp, (N, 3), jnp.float32)

    # deterministic ring graph (both directions): edge_index shape [2, 2N]
    idx = jnp.arange(N)
    src = jnp.concatenate([idx, (idx + 1) % N])
    dst = jnp.concatenate([(idx + 1) % N, idx])
    edge_index = jnp.stack([src, dst])
    adj_norm = build_normalized_adjacency(edge_index, N)

    params = init_params(k_par, hidden)

    out = forward(params, des, tweet, num_prop, cat_prop, adj_norm)
    out = jax.block_until_ready(out)
    assert out.shape == (N, 2) and out.dtype == jnp.float32
    assert bool(jnp.all(jnp.isfinite(out)))

    ref = forward_ref(params, des, tweet, num_prop, cat_prop, adj_norm)
    assert bool(jnp.allclose(out, ref, rtol=1e-3, atol=1e-3))

    print("KERNEL_OK")
</pallas_src>

<mosaic_0001>
module attributes {stable_mosaic.version = 11 : i64} {
  func.func @_gcn_kernel(%arg0: i32, %arg1: memref<16x16xf32, #tpu.memory_space<vmem>>, %arg2: memref<16x32xf32, #tpu.memory_space<vmem>>, %arg3: memref<32x32xf32, #tpu.memory_space<vmem>>, %arg4: memref<1x32xf32, #tpu.memory_space<vmem>>, %arg5: memref<16x32xf32, #tpu.memory_space<vmem>>) attributes {dimension_semantics = [#tpu.dimension_semantics<parallel>], iteration_bounds = array<i64: 1>, scalar_prefetch = 0 : i64, scratch_operands = 0 : i64, tpu.core_type = #tpu.core_type<tc>, window_params = [{transform_indices = @transform_0, window_bounds = array<i64: 16, 16>}, {pipeline_mode = #tpu.pipeline_mode<synchronous>, transform_indices = @transform_1, window_bounds = array<i64: 16, 32>}, {pipeline_mode = #tpu.pipeline_mode<synchronous>, transform_indices = @transform_2, window_bounds = array<i64: 32, 32>}, {pipeline_mode = #tpu.pipeline_mode<synchronous>, transform_indices = @transform_3, window_bounds = array<i64: 1, 32>}, {transform_indices = @transform_4, window_bounds = array<i64: 16, 32>}]} {
    %c0 = arith.constant 0 : index
    %c0_0 = arith.constant 0 : index
    %0 = vector.load %arg1[%c0, %c0_0] : memref<16x16xf32, #tpu.memory_space<vmem>>, vector<16x16xf32>
    %c0_1 = arith.constant 0 : index
    %c0_2 = arith.constant 0 : index
    %1 = vector.load %arg2[%c0_1, %c0_2] : memref<16x32xf32, #tpu.memory_space<vmem>>, vector<16x32xf32>
    %cst = arith.constant dense<0.000000e+00> : vector<16x32xf32>
    %2 = tpu.matmul %0, %1, %cst {dimension_numbers = #tpu.dot_dimension_numbers<[1], [0], [0], [1], [0, 0, 1, 1], [], []>} : vector<16x16xf32>, vector<16x32xf32>, vector<16x32xf32> -> vector<16x32xf32>
    %c0_3 = arith.constant 0 : index
    %c0_4 = arith.constant 0 : index
    %3 = vector.load %arg3[%c0_3, %c0_4] : memref<32x32xf32, #tpu.memory_space<vmem>>, vector<32x32xf32>
    %cst_5 = arith.constant dense<0.000000e+00> : vector<16x32xf32>
    %4 = tpu.matmul %2, %3, %cst_5 {dimension_numbers = #tpu.dot_dimension_numbers<[1], [0], [0], [1], [0, 0, 1, 1], [], []>} : vector<16x32xf32>, vector<32x32xf32>, vector<16x32xf32> -> vector<16x32xf32>
    %c0_6 = arith.constant 0 : index
    %c0_7 = arith.constant 0 : index
    %5 = vector.load %arg4[%c0_6, %c0_7] : memref<1x32xf32, #tpu.memory_space<vmem>>, vector<1x32xf32>
    %6 = vector.broadcast %5 : vector<1x32xf32> to vector<16x32xf32>
    %7 = arith.addf %4, %6 : vector<16x32xf32>
    %c0_8 = arith.constant 0 : index
    %c0_9 = arith.constant 0 : index
    %8 = vector.load %arg5[%c0_8, %c0_9] : memref<16x32xf32, #tpu.memory_space<vmem>>, vector<16x32xf32>
    tpu.vector_store %arg5[%c0_8, %c0_9], %7 {strides = array<i32>} : memref<16x32xf32, #tpu.memory_space<vmem>>, vector<16x32xf32>,
    return
  }
  func.func @transform_0(%arg0: i32) -> (i32, i32) {
    %c0_i32 = arith.constant 0 : i32
    %c0_i32_0 = arith.constant 0 : i32
    return %arg0, %c0_i32 : i32, i32
  }
  func.func @transform_1(%arg0: i32) -> (i32, i32) {
    %c0_i32 = arith.constant 0 : i32
    %c0_i32_0 = arith.constant 0 : i32
    %c0_i32_1 = arith.constant 0 : i32
    return %c0_i32, %c0_i32_0 : i32, i32
  }
  func.func @transform_2(%arg0: i32) -> (i32, i32) {
    %c0_i32 = arith.constant 0 : i32
    %c0_i32_0 = arith.constant 0 : i32
    %c0_i32_1 = arith.constant 0 : i32
    return %c0_i32, %c0_i32_0 : i32, i32
  }
  func.func @transform_3(%arg0: i32) -> (i32, i32) {
    %c0_i32 = arith.constant 0 : i32
    %c0_i32_0 = arith.constant 0 : i32
    %c0_i32_1 = arith.constant 0 : i32
    return %c0_i32, %c0_i32_0 : i32, i32
  }
  func.func @transform_4(%arg0: i32) -> (i32, i32) {
    %c0_i32 = arith.constant 0 : i32
    %c0_i32_0 = arith.constant 0 : i32
    return %arg0, %c0_i32 : i32, i32
  }
}

module attributes {stable_mosaic.version = 11 : i64} {
  func.func @_front_kernel(%arg0: i32, %arg1: memref<16x1544xf32, #tpu.memory_space<vmem>>, %arg2: memref<1544x32xf32, #tpu.memory_space<vmem>>, %arg3: memref<1x32xf32, #tpu.memory_space<vmem>>, %arg4: memref<32x32xf32, #tpu.memory_space<vmem>>, %arg5: memref<1x32xf32, #tpu.memory_space<vmem>>, %arg6: memref<16x32xf32, #tpu.memory_space<vmem>>) attributes {dimension_semantics = [#tpu.dimension_semantics<parallel>], iteration_bounds = array<i64: 1>, scalar_prefetch = 0 : i64, scratch_operands = 0 : i64, tpu.core_type = #tpu.core_type<tc>, window_params = [{transform_indices = @transform_0, window_bounds = array<i64: 16, 1544>}, {pipeline_mode = #tpu.pipeline_mode<synchronous>, transform_indices = @transform_1, window_bounds = array<i64: 1544, 32>}, {pipeline_mode = #tpu.pipeline_mode<synchronous>, transform_indices = @transform_2, window_bounds = array<i64: 1, 32>}, {pipeline_mode = #tpu.pipeline_mode<synchronous>, transform_indices = @transform_3, window_bounds = array<i64: 32, 32>}, {pipeline_mode = #tpu.pipeline_mode<synchronous>, transform_indices = @transform_4, window_bounds = array<i64: 1, 32>}, {transform_indices = @transform_5, window_bounds = array<i64: 16, 32>}]} {
    %c0 = arith.constant 0 : index
    %c0_0 = arith.constant 0 : index
    %0 = vector.load %arg1[%c0, %c0_0] : memref<16x1544xf32, #tpu.memory_space<vmem>>, vector<16x1544xf32>
    %c0_1 = arith.constant 0 : index
    %c0_2 = arith.constant 0 : index
    %1 = vector.load %arg2[%c0_1, %c0_2] : memref<1544x32xf32, #tpu.memory_space<vmem>>, vector<1544x32xf32>
    %cst = arith.constant dense<0.000000e+00> : vector<16x32xf32>
    %2 = tpu.matmul %0, %1, %cst {dimension_numbers = #tpu.dot_dimension_numbers<[1], [0], [0], [1], [0, 0, 1, 1], [], []>} : vector<16x1544xf32>, vector<1544x32xf32>, vector<16x32xf32> -> vector<16x32xf32>
    %c0_3 = arith.constant 0 : index
    %c0_4 = arith.constant 0 : index
    %3 = vector.load %arg3[%c0_3, %c0_4] : memref<1x32xf32, #tpu.memory_space<vmem>>, vector<1x32xf32>
    %4 = vector.broadcast %3 : vector<1x32xf32> to vector<16x32xf32>
    %5 = arith.addf %2, %4 : vector<16x32xf32>
    %cst_5 = arith.constant 0.000000e+00 : f32
    %6 = vector.broadcast %cst_5 : f32 to vector<16x32xf32>
    %7 = arith.cmpf ogt, %5, %6 : vector<16x32xf32>
    %cst_6 = arith.constant 0.00999999977 : f32
    %8 = vector.broadcast %cst_6 : f32 to vector<16x32xf32>
    %9 = arith.mulf %8, %5 : vector<16x32xf32>
    %10 = arith.select %7, %5, %9 : vector<16x32xi1>, vector<16x32xf32>
    %c0_7 = arith.constant 0 : index
    %c0_8 = arith.constant 0 : index
    %11 = vector.load %arg4[%c0_7, %c0_8] : memref<32x32xf32, #tpu.memory_space<vmem>>, vector<32x32xf32>
    %cst_9 = arith.constant dense<0.000000e+00> : vector<16x32xf32>
    %12 = tpu.matmul %10, %11, %cst_9 {dimension_numbers = #tpu.dot_dimension_numbers<[1], [0], [0], [1], [0, 0, 1, 1], [], []>} : vector<16x32xf32>, vector<32x32xf32>, vector<16x32xf32> -> vector<16x32xf32>
    %c0_10 = arith.constant 0 : index
    %c0_11 = arith.constant 0 : index
    %13 = vector.load %arg5[%c0_10, %c0_11] : memref<1x32xf32, #tpu.memory_space<vmem>>, vector<1x32xf32>
    %14 = vector.broadcast %13 : vector<1x32xf32> to vector<16x32xf32>
    %15 = arith.addf %12, %14 : vector<16x32xf32>
    %cst_12 = arith.constant 0.000000e+00 : f32
    %16 = vector.broadcast %cst_12 : f32 to vector<16x32xf32>
    %17 = arith.cmpf ogt, %15, %16 : vector<16x32xf32>
    %cst_13 = arith.constant 0.00999999977 : f32
    %18 = vector.broadcast %cst_13 : f32 to vector<16x32xf32>
    %19 = arith.mulf %18, %15 : vector<16x32xf32>
    %20 = arith.select %17, %15, %19 : vector<16x32xi1>, vector<16x32xf32>
    %c0_14 = arith.constant 0 : index
    %c0_15 = arith.constant 0 : index
    %21 = vector.load %arg6[%c0_14, %c0_15] : memref<16x32xf32, #tpu.memory_space<vmem>>, vector<16x32xf32>
    tpu.vector_store %arg6[%c0_14, %c0_15], %20 {strides = array<i32>} : memref<16x32xf32, #tpu.memory_space<vmem>>, vector<16x32xf32>,
    return
  }
  func.func @transform_0(%arg0: i32) -> (i32, i32) {
    %c0_i32 = arith.constant 0 : i32
    %c0_i32_0 = arith.constant 0 : i32
    return %arg0, %c0_i32 : i32, i32
  }
  func.func @transform_1(%arg0: i32) -> (i32, i32) {
    %c0_i32 = arith.constant 0 : i32
    %c0_i32_0 = arith.constant 0 : i32
    %c0_i32_1 = arith.constant 0 : i32
    return %c0_i32, %c0_i32_0 : i32, i32
  }
  func.func @transform_2(%arg0: i32) -> (i32, i32) {
    %c0_i32 = arith.constant 0 : i32
    %c0_i32_0 = arith.constant 0 : i32
    %c0_i32_1 = arith.constant 0 : i32
    return %c0_i32, %c0_i32_0 : i32, i32
  }
  func.func @transform_3(%arg0: i32) -> (i32, i32) {
    %c0_i32 = arith.constant 0 : i32
    %c0_i32_0 = arith.constant 0 : i32
    %c0_i32_1 = arith.constant 0 : i32
    return %c0_i32, %c0_i32_0 : i32, i32
  }
  func.func @transform_4(%arg0: i32) -> (i32, i32) {
    %c0_i32 = arith.constant 0 : i32
    %c0_i32_0 = arith.constant 0 : i32
    %c0_i32_1 = arith.constant 0 : i32
    return %c0_i32, %c0_i32_0 : i32, i32
  }
  func.func @transform_5(%arg0: i32) -> (i32, i32) {
    %c0_i32 = arith.constant 0 : i32
    %c0_i32_0 = arith.constant 0 : i32
    return %arg0, %c0_i32 : i32, i32
  }
}

module attributes {stable_mosaic.version = 11 : i64} {
  func.func @_gcn_linear_kernel(%arg0: i32, %arg1: memref<16x16xf32, #tpu.memory_space<vmem>>, %arg2: memref<16x32xf32, #tpu.memory_space<vmem>>, %arg3: memref<32x32xf32, #tpu.memory_space<vmem>>, %arg4: memref<1x32xf32, #tpu.memory_space<vmem>>, %arg5: memref<32x16xf32, #tpu.memory_space<vmem>>, %arg6: memref<1x16xf32, #tpu.memory_space<vmem>>, %arg7: memref<16x16xf32, #tpu.memory_space<vmem>>) attributes {dimension_semantics = [#tpu.dimension_semantics<parallel>], iteration_bounds = array<i64: 1>, scalar_prefetch = 0 : i64, scratch_operands = 0 : i64, tpu.core_type = #tpu.core_type<tc>, window_params = [{transform_indices = @transform_0, window_bounds = array<i64: 16, 16>}, {pipeline_mode = #tpu.pipeline_mode<synchronous>, transform_indices = @transform_1, window_bounds = array<i64: 16, 32>}, {pipeline_mode = #tpu.pipeline_mode<synchronous>, transform_indices = @transform_2, window_bounds = array<i64: 32, 32>}, {pipeline_mode = #tpu.pipeline_mode<synchronous>, transform_indices = @transform_3, window_bounds = array<i64: 1, 32>}, {pipeline_mode = #tpu.pipeline_mode<synchronous>, transform_indices = @transform_4, window_bounds = array<i64: 32, 16>}, {pipeline_mode = #tpu.pipeline_mode<synchronous>, transform_indices = @transform_5, window_bounds = array<i64: 1, 16>}, {transform_indices = @transform_6, window_bounds = array<i64: 16, 16>}]} {
    %c0 = arith.constant 0 : index
    %c0_0 = arith.constant 0 : index
    %0 = vector.load %arg1[%c0, %c0_0] : memref<16x16xf32, #tpu.memory_space<vmem>>, vector<16x16xf32>
    %c0_1 = arith.constant 0 : index
    %c0_2 = arith.constant 0 : index
    %1 = vector.load %arg2[%c0_1, %c0_2] : memref<16x32xf32, #tpu.memory_space<vmem>>, vector<16x32xf32>
    %cst = arith.constant dense<0.000000e+00> : vector<16x32xf32>
    %2 = tpu.matmul %0, %1, %cst {dimension_numbers = #tpu.dot_dimension_numbers<[1], [0], [0], [1], [0, 0, 1, 1], [], []>} : vector<16x16xf32>, vector<16x32xf32>, vector<16x32xf32> -> vector<16x32xf32>
    %c0_3 = arith.constant 0 : index
    %c0_4 = arith.constant 0 : index
    %3 = vector.load %arg3[%c0_3, %c0_4] : memref<32x32xf32, #tpu.memory_space<vmem>>, vector<32x32xf32>
    %cst_5 = arith.constant dense<0.000000e+00> : vector<16x32xf32>
    %4 = tpu.matmul %2, %3, %cst_5 {dimension_numbers = #tpu.dot_dimension_numbers<[1], [0], [0], [1], [0, 0, 1, 1], [], []>} : vector<16x32xf32>, vector<32x32xf32>, vector<16x32xf32> -> vector<16x32xf32>
    %c0_6 = arith.constant 0 : index
    %c0_7 = arith.constant 0 : index
    %5 = vector.load %arg4[%c0_6, %c0_7] : memref<1x32xf32, #tpu.memory_space<vmem>>, vector<1x32xf32>
    %6 = vector.broadcast %5 : vector<1x32xf32> to vector<16x32xf32>
    %7 = arith.addf %4, %6 : vector<16x32xf32>
    %c0_8 = arith.constant 0 : index
    %c0_9 = arith.constant 0 : index
    %8 = vector.load %arg5[%c0_8, %c0_9] : memref<32x16xf32, #tpu.memory_space<vmem>>, vector<32x16xf32>
    %cst_10 = arith.constant dense<0.000000e+00> : vector<16x16xf32>
    %9 = tpu.matmul %7, %8, %cst_10 {dimension_numbers = #tpu.dot_dimension_numbers<[1], [0], [0], [1], [0, 0, 1, 1], [], []>} : vector<16x32xf32>, vector<32x16xf32>, vector<16x16xf32> -> vector<16x16xf32>
    %c0_11 = arith.constant 0 : index
    %c0_12 = arith.constant 0 : index
    %10 = vector.load %arg6[%c0_11, %c0_12] : memref<1x16xf32, #tpu.memory_space<vmem>>, vector<1x16xf32>
    %11 = vector.broadcast %10 : vector<1x16xf32> to vector<16x16xf32>
    %12 = arith.addf %9, %11 : vector<16x16xf32>
    %cst_13 = arith.constant 0.000000e+00 : f32
    %13 = vector.broadcast %cst_13 : f32 to vector<16x16xf32>
    %14 = arith.cmpf ogt, %12, %13 : vector<16x16xf32>
    %cst_14 = arith.constant 0.00999999977 : f32
    %15 = vector.broadcast %cst_14 : f32 to vector<16x16xf32>
    %16 = arith.mulf %15, %12 : vector<16x16xf32>
    %17 = arith.select %14, %12, %16 : vector<16x16xi1>, vector<16x16xf32>
    %c0_15 = arith.constant 0 : index
    %c0_16 = arith.constant 0 : index
    %18 = vector.load %arg7[%c0_15, %c0_16] : memref<16x16xf32, #tpu.memory_space<vmem>>, vector<16x16xf32>
    tpu.vector_store %arg7[%c0_15, %c0_16], %17 {strides = array<i32>} : memref<16x16xf32, #tpu.memory_space<vmem>>, vector<16x16xf32>,
    return
  }
  func.func @transform_0(%arg0: i32) -> (i32, i32) {
    %c0_i32 = arith.constant 0 : i32
    %c0_i32_0 = arith.constant 0 : i32
    return %arg0, %c0_i32 : i32, i32
  }
  func.func @transform_1(%arg0: i32) -> (i32, i32) {
    %c0_i32 = arith.constant 0 : i32
    %c0_i32_0 = arith.constant 0 : i32
    %c0_i32_1 = arith.constant 0 : i32
    return %c0_i32, %c0_i32_0 : i32, i32
  }
  func.func @transform_2(%arg0: i32) -> (i32, i32) {
    %c0_i32 = arith.constant 0 : i32
    %c0_i32_0 = arith.constant 0 : i32
    %c0_i32_1 = arith.constant 0 : i32
    return %c0_i32, %c0_i32_0 : i32, i32
  }
  func.func @transform_3(%arg0: i32) -> (i32, i32) {
    %c0_i32 = arith.constant 0 : i32
    %c0_i32_0 = arith.constant 0 : i32
    %c0_i32_1 = arith.constant 0 : i32
    return %c0_i32, %c0_i32_0 : i32, i32
  }
  func.func @transform_4(%arg0: i32) -> (i32, i32) {
    %c0_i32 = arith.constant 0 : i32
    %c0_i32_0 = arith.constant 0 : i32
    %c0_i32_1 = arith.constant 0 : i32
    return %c0_i32, %c0_i32_0 : i32, i32
  }
  func.func @transform_5(%arg0: i32) -> (i32, i32) {
    %c0_i32 = arith.constant 0 : i32
    %c0_i32_0 = arith.constant 0 : i32
    %c0_i32_1 = arith.constant 0 : i32
    return %c0_i32, %c0_i32_0 : i32, i32
  }
  func.func @transform_6(%arg0: i32) -> (i32, i32) {
    %c0_i32 = arith.constant 0 : i32
    %c0_i32_0 = arith.constant 0 : i32
    return %arg0, %c0_i32 : i32, i32
  }
}

module attributes {stable_mosaic.version = 11 : i64} {
  func.func @_gcn_tail_kernel(%arg0: i32, %arg1: memref<16x16xf32, #tpu.memory_space<vmem>>, %arg2: memref<16x16xf32, #tpu.memory_space<vmem>>, %arg3: memref<16x16xf32, #tpu.memory_space<vmem>>, %arg4: memref<1x16xf32, #tpu.memory_space<vmem>>, %arg5: memref<16x16xf32, #tpu.memory_space<vmem>>, %arg6: memref<1x16xf32, #tpu.memory_space<vmem>>, %arg7: memref<16x8xf32, #tpu.memory_space<vmem>>, %arg8: memref<1x8xf32, #tpu.memory_space<vmem>>, %arg9: memref<8x4xf32, #tpu.memory_space<vmem>>, %arg10: memref<1x4xf32, #tpu.memory_space<vmem>>, %arg11: memref<4x2xf32, #tpu.memory_space<vmem>>, %arg12: memref<1x2xf32, #tpu.memory_space<vmem>>, %arg13: memref<16x2xf32, #tpu.memory_space<vmem>>) attributes {dimension_semantics = [#tpu.dimension_semantics<parallel>], iteration_bounds = array<i64: 1>, scalar_prefetch = 0 : i64, scratch_operands = 0 : i64, tpu.core_type = #tpu.core_type<tc>, window_params = [{transform_indices = @transform_0, window_bounds = array<i64: 16, 16>}, {pipeline_mode = #tpu.pipeline_mode<synchronous>, transform_indices = @transform_1, window_bounds = array<i64: 16, 16>}, {pipeline_mode = #tpu.pipeline_mode<synchronous>, transform_indices = @transform_2, window_bounds = array<i64: 16, 16>}, {pipeline_mode = #tpu.pipeline_mode<synchronous>, transform_indices = @transform_3, window_bounds = array<i64: 1, 16>}, {pipeline_mode = #tpu.pipeline_mode<synchronous>, transform_indices = @transform_4, window_bounds = array<i64: 16, 16>}, {pipeline_mode = #tpu.pipeline_mode<synchronous>, transform_indices = @transform_5, window_bounds = array<i64: 1, 16>}, {pipeline_mode = #tpu.pipeline_mode<synchronous>, transform_indices = @transform_6, window_bounds = array<i64: 16, 8>}, {pipeline_mode = #tpu.pipeline_mode<synchronous>, transform_indices = @transform_7, window_bounds = array<i64: 1, 8>}, {pipeline_mode = #tpu.pipeline_mode<synchronous>, transform_indices = @transform_8, window_bounds = array<i64: 8, 4>}, {pipeline_mode = #tpu.pipeline_mode<synchronous>, transform_indices = @transform_9, window_bounds = array<i64: 1, 4>}, {pipeline_mode = #tpu.pipeline_mode<synchronous>, transform_indices = @transform_10, window_bounds = array<i64: 4, 2>}, {pipeline_mode = #tpu.pipeline_mode<synchronous>, transform_indices = @transform_11, window_bounds = array<i64: 1, 2>}, {transform_indices = @transform_12, window_bounds = array<i64: 16, 2>}]} {
    %c0 = arith.constant 0 : index
    %c0_0 = arith.constant 0 : index
    %0 = vector.load %arg1[%c0, %c0_0] : memref<16x16xf32, #tpu.memory_space<vmem>>, vector<16x16xf32>
    %c0_1 = arith.constant 0 : index
    %c0_2 = arith.constant 0 : index
    %1 = vector.load %arg2[%c0_1, %c0_2] : memref<16x16xf32, #tpu.memory_space<vmem>>, vector<16x16xf32>
    %cst = arith.constant dense<0.000000e+00> : vector<16x16xf32>
    %2 = tpu.matmul %0, %1, %cst {dimension_numbers = #tpu.dot_dimension_numbers<[1], [0], [0], [1], [0, 0, 1, 1], [], []>} : vector<16x16xf32>, vector<16x16xf32>, vector<16x16xf32> -> vector<16x16xf32>
    %c0_3 = arith.constant 0 : index
    %c0_4 = arith.constant 0 : index
    %3 = vector.load %arg3[%c0_3, %c0_4] : memref<16x16xf32, #tpu.memory_space<vmem>>, vector<16x16xf32>
    %cst_5 = arith.constant dense<0.000000e+00> : vector<16x16xf32>
    %4 = tpu.matmul %2, %3, %cst_5 {dimension_numbers = #tpu.dot_dimension_numbers<[1], [0], [0], [1], [0, 0, 1, 1], [], []>} : vector<16x16xf32>, vector<16x16xf32>, vector<16x16xf32> -> vector<16x16xf32>
    %c0_6 = arith.constant 0 : index
    %c0_7 = arith.constant 0 : index
    %5 = vector.load %arg4[%c0_6, %c0_7] : memref<1x16xf32, #tpu.memory_space<vmem>>, vector<1x16xf32>
    %6 = vector.broadcast %5 : vector<1x16xf32> to vector<16x16xf32>
    %7 = arith.addf %4, %6 : vector<16x16xf32>
    %c0_8 = arith.constant 0 : index
    %c0_9 = arith.constant 0 : index
    %8 = vector.load %arg5[%c0_8, %c0_9] : memref<16x16xf32, #tpu.memory_space<vmem>>, vector<16x16xf32>
    %cst_10 = arith.constant dense<0.000000e+00> : vector<16x16xf32>
    %9 = tpu.matmul %7, %8, %cst_10 {dimension_numbers = #tpu.dot_dimension_numbers<[1], [0], [0], [1], [0, 0, 1, 1], [], []>} : vector<16x16xf32>, vector<16x16xf32>, vector<16x16xf32> -> vector<16x16xf32>
    %c0_11 = arith.constant 0 : index
    %c0_12 = arith.constant 0 : index
    %10 = vector.load %arg6[%c0_11, %c0_12] : memref<1x16xf32, #tpu.memory_space<vmem>>, vector<1x16xf32>
    %11 = vector.broadcast %10 : vector<1x16xf32> to vector<16x16xf32>
    %12 = arith.addf %9, %11 : vector<16x16xf32>
    %cst_13 = arith.constant 0.000000e+00 : f32
    %13 = vector.broadcast %cst_13 : f32 to vector<16x16xf32>
    %14 = arith.cmpf ogt, %12, %13 : vector<16x16xf32>
    %cst_14 = arith.constant 0.00999999977 : f32
    %15 = vector.broadcast %cst_14 : f32 to vector<16x16xf32>
    %16 = arith.mulf %15, %12 : vector<16x16xf32>
    %17 = arith.select %14, %12, %16 : vector<16x16xi1>, vector<16x16xf32>
    %c0_15 = arith.constant 0 : index
    %c0_16 = arith.constant 0 : index
    %18 = vector.load %arg7[%c0_15, %c0_16] : memref<16x8xf32, #tpu.memory_space<vmem>>, vector<16x8xf32>
    %cst_17 = arith.constant dense<0.000000e+00> : vector<16x8xf32>
    %19 = tpu.matmul %17, %18, %cst_17 {dimension_numbers = #tpu.dot_dimension_numbers<[1], [0], [0], [1], [0, 0, 1, 1], [], []>} : vector<16x16xf32>, vector<16x8xf32>, vector<16x8xf32> -> vector<16x8xf32>
    %c0_18 = arith.constant 0 : index
    %c0_19 = arith.constant 0 : index
    %20 = vector.load %arg8[%c0_18, %c0_19] : memref<1x8xf32, #tpu.memory_space<vmem>>, vector<1x8xf32>
    %21 = vector.broadcast %20 : vector<1x8xf32> to vector<16x8xf32>
    %22 = arith.addf %19, %21 : vector<16x8xf32>
    %cst_20 = arith.constant 0.000000e+00 : f32
    %23 = vector.broadcast %cst_20 : f32 to vector<16x8xf32>
    %24 = arith.cmpf ogt, %22, %23 : vector<16x8xf32>
    %cst_21 = arith.constant 0.00999999977 : f32
    %25 = vector.broadcast %cst_21 : f32 to vector<16x8xf32>
    %26 = arith.mulf %25, %22 : vector<16x8xf32>
    %27 = arith.select %24, %22, %26 : vector<16x8xi1>, vector<16x8xf32>
    %c0_22 = arith.constant 0 : index
    %c0_23 = arith.constant 0 : index
    %28 = vector.load %arg9[%c0_22, %c0_23] : memref<8x4xf32, #tpu.memory_space<vmem>>, vector<8x4xf32>
    %cst_24 = arith.constant dense<0.000000e+00> : vector<16x4xf32>
    %29 = tpu.matmul %27, %28, %cst_24 {dimension_numbers = #tpu.dot_dimension_numbers<[1], [0], [0], [1], [0, 0, 1, 1], [], []>} : vector<16x8xf32>, vector<8x4xf32>, vector<16x4xf32> -> vector<16x4xf32>
    %c0_25 = arith.constant 0 : index
    %c0_26 = arith.constant 0 : index
    %30 = vector.load %arg10[%c0_25, %c0_26] : memref<1x4xf32, #tpu.memory_space<vmem>>, vector<1x4xf32>
    %31 = vector.broadcast %30 : vector<1x4xf32> to vector<16x4xf32>
    %32 = arith.addf %29, %31 : vector<16x4xf32>
    %cst_27 = arith.constant 0.000000e+00 : f32
    %33 = vector.broadcast %cst_27 : f32 to vector<16x4xf32>
    %34 = arith.cmpf ogt, %32, %33 : vector<16x4xf32>
    %cst_28 = arith.constant 0.00999999977 : f32
    %35 = vector.broadcast %cst_28 : f32 to vector<16x4xf32>
    %36 = arith.mulf %35, %32 : vector<16x4xf32>
    %37 = arith.select %34, %32, %36 : vector<16x4xi1>, vector<16x4xf32>
    %c0_29 = arith.constant 0 : index
    %c0_30 = arith.constant 0 : index
    %38 = vector.load %arg11[%c0_29, %c0_30] : memref<4x2xf32, #tpu.memory_space<vmem>>, vector<4x2xf32>
    %cst_31 = arith.constant dense<0.000000e+00> : vector<16x2xf32>
    %39 = tpu.matmul %37, %38, %cst_31 {dimension_numbers = #tpu.dot_dimension_numbers<[1], [0], [0], [1], [0, 0, 1, 1], [], []>} : vector<16x4xf32>, vector<4x2xf32>, vector<16x2xf32> -> vector<16x2xf32>
    %c0_32 = arith.constant 0 : index
    %c0_33 = arith.constant 0 : index
    %40 = vector.load %arg12[%c0_32, %c0_33] : memref<1x2xf32, #tpu.memory_space<vmem>>, vector<1x2xf32>
    %41 = vector.broadcast %40 : vector<1x2xf32> to vector<16x2xf32>
    %42 = arith.addf %39, %41 : vector<16x2xf32>
    %c0_34 = arith.constant 0 : index
    %c0_35 = arith.constant 0 : index
    %43 = vector.load %arg13[%c0_34, %c0_35] : memref<16x2xf32, #tpu.memory_space<vmem>>, vector<16x2xf32>
    tpu.vector_store %arg13[%c0_34, %c0_35], %42 {strides = array<i32>} : memref<16x2xf32, #tpu.memory_space<vmem>>, vector<16x2xf32>,
    return
  }
  func.func @transform_0(%arg0: i32) -> (i32, i32) {
    %c0_i32 = arith.constant 0 : i32
    %c0_i32_0 = arith.constant 0 : i32
    return %arg0, %c0_i32 : i32, i32
  }
  func.func @transform_1(%arg0: i32) -> (i32, i32) {
    %c0_i32 = arith.constant 0 : i32
    %c0_i32_0 = arith.constant 0 : i32
    %c0_i32_1 = arith.constant 0 : i32
    return %c0_i32, %c0_i32_0 : i32, i32
  }
  func.func @transform_2(%arg0: i32) -> (i32, i32) {
    %c0_i32 = arith.constant 0 : i32
    %c0_i32_0 = arith.constant 0 : i32
    %c0_i32_1 = arith.constant 0 : i32
    return %c0_i32, %c0_i32_0 : i32, i32
  }
  func.func @transform_3(%arg0: i32) -> (i32, i32) {
    %c0_i32 = arith.constant 0 : i32
    %c0_i32_0 = arith.constant 0 : i32
    %c0_i32_1 = arith.constant 0 : i32
    return %c0_i32, %c0_i32_0 : i32, i32
  }
  func.func @transform_4(%arg0: i32) -> (i32, i32) {
    %c0_i32 = arith.constant 0 : i32
    %c0_i32_0 = arith.constant 0 : i32
    %c0_i32_1 = arith.constant 0 : i32
    return %c0_i32, %c0_i32_0 : i32, i32
  }
  func.func @transform_5(%arg0: i32) -> (i32, i32) {
    %c0_i32 = arith.constant 0 : i32
    %c0_i32_0 = arith.constant 0 : i32
    %c0_i32_1 = arith.constant 0 : i32
    return %c0_i32, %c0_i32_0 : i32, i32
  }
  func.func @transform_6(%arg0: i32) -> (i32, i32) {
    %c0_i32 = arith.constant 0 : i32
    %c0_i32_0 = arith.constant 0 : i32
    %c0_i32_1 = arith.constant 0 : i32
    return %c0_i32, %c0_i32_0 : i32, i32
  }
  func.func @transform_7(%arg0: i32) -> (i32, i32) {
    %c0_i32 = arith.constant 0 : i32
    %c0_i32_0 = arith.constant 0 : i32
    %c0_i32_1 = arith.constant 0 : i32
    return %c0_i32, %c0_i32_0 : i32, i32
  }
  func.func @transform_8(%arg0: i32) -> (i32, i32) {
    %c0_i32 = arith.constant 0 : i32
    %c0_i32_0 = arith.constant 0 : i32
    %c0_i32_1 = arith.constant 0 : i32
    return %c0_i32, %c0_i32_0 : i32, i32
  }
  func.func @transform_9(%arg0: i32) -> (i32, i32) {
    %c0_i32 = arith.constant 0 : i32
    %c0_i32_0 = arith.constant 0 : i32
    %c0_i32_1 = arith.constant 0 : i32
    return %c0_i32, %c0_i32_0 : i32, i32
  }
  func.func @transform_10(%arg0: i32) -> (i32, i32) {
    %c0_i32 = arith.constant 0 : i32
    %c0_i32_0 = arith.constant 0 : i32
    %c0_i32_1 = arith.constant 0 : i32
    return %c0_i32, %c0_i32_0 : i32, i32
  }
  func.func @transform_11(%arg0: i32) -> (i32, i32) {
    %c0_i32 = arith.constant 0 : i32
    %c0_i32_0 = arith.constant 0 : i32
    %c0_i32_1 = arith.constant 0 : i32
    return %c0_i32, %c0_i32_0 : i32, i32
  }
  func.func @transform_12(%arg0: i32) -> (i32, i32) {
    %c0_i32 = arith.constant 0 : i32
    %c0_i32_0 = arith.constant 0 : i32
    return %arg0, %c0_i32 : i32, i32
  }
}

</mosaic_0001>

<bundles_post_ra>
// kernel: forward.5
= control target key start
LH: loop header
LB: loop body
LE: loop exit
PB: predicated region body
PF: predicated region fallthrough
CT: control target
= control target key end

     0   :  { %vm21_vm0 = vcmask 130048   ;;  %vm114_vm1 = vcmask 261120   ;;  %s307_s1 = inlined_call_operand.vmem [shape: f32[16,32], index: 1, kind: input, shape index: {}]   ;;  %s308_s0 = inlined_call_operand.vmem [shape: f32[16,16], index: 0, kind: input, shape index: {}]   ;;  %s309_s2 = inlined_call_operand.vmem [shape: f32[32,32], index: 2, kind: input, shape index: {}]   ;;  %s310_s3 = inlined_call_operand.vmem [shape: f32[1,32], index: 3, kind: input, shape index: {}]   ;;  %s311_s4 = inlined_call_operand.vmem [shape: f32[16,32], index: 4, kind: output, shape index: {}]  }
   0x1   :  { %v19_v0 = vld [vmem:[%s307_s1] sm:$0xff]  ;;  %v20_v1 = vld [vmem:[%s307_s1 + $0x8] sm:$0xff]  ;;  %v105_v7 = vld [vmem:[%s309_s2 + $0x10] sm:$0xff] }
   0x2   :  { %v17_v2 = vld [vmem:[%s308_s0] sm:$0xff]  ;;  %v235_v3 = vpack.c.bf16 %v20_v1, %v19_v0  ;;  %v104_v5 = vld [vmem:[%s309_s2 + $0x8] sm:$0xff]  ;;  %v106_v8 = vld [vmem:[%s309_s2 + $0x18] sm:$0xff] }
   0x3   :  { %221 = vmatprep.mubr.msk.f32.mxu0 %vm21_vm0, %v17_v2  ;;  %v103_v4 = vld [vmem:[%s309_s2] sm:$0xff]  ;;  %v243_v9 = vpack.c.bf16 %v106_v8, %v105_v7  ;;  %v18_v10 = vld [vmem:[%s308_s0 + $0x8] sm:$0xff] }
   0x4   :  { %v239_v6 = vpack.c.bf16 %v104_v5, %v103_v4  ;;  %236 = vmatprep.subr.bf16.mxu0 %v235_v3  ;;  %v204_v13 = vld [vmem:[%s310_s3] ss:$0 sm:$0xff] }
   0x5   :  { %238 = vmatpush3.bf16.msra.mxu0 %v235_v3 }
   0x6   :  { %240 = vmatprep.subr.bf16.mxu1 %v239_v6 }
   0x7   :  { %242 = vmatpush3.bf16.msra.mxu1 %v239_v6 }
   0x8   :  { %244 = vmatprep.subr.bf16.mxu1 %v243_v9  ;;  %222 = vmatmul.mubr.msk.f32.vlgmr.msra.gmra.mrb[0].mxu0 %vm21_vm0, %v18_v10 }
   0xb   :  { %246 = vmatpush3.bf16.msra.mxu1 %v243_v9 }
  0xdb   :  { %v223_v11 = vpop.f32.mrb[0].mxu0 }
  0xdc   :  { %v94_v12 = vpop.f32.mrb[1].mxu0 }
  0xdd   :  { %232 = vmatprep.mubr.msk.f32.mxu1 %vm114_vm1, %v94_v12 }
  0xde   :  { %233 = vmatmul.mubr.msk.f32.vlgmr.msra.gmra.mrb[0].mxu1 %vm114_vm1, %v223_v11 }
 0x1b1   :  { %v234_v14 = vpop.f32.mrb[0].mxu1 }
 0x1b2   :  { %v193_v15 = vadd.f32 %v234_v14, %v204_v13  ;;  %v187_v16 = vpop.f32.mrb[1].mxu1 }
 0x1b3   :  { %v188_v17 = vadd.f32 %v204_v13, %v187_v16 }
 0x1b4   :  { %197 = vst.msk [vmem:[%s311_s4 + $0x8] sm:$0xff] %vm114_vm1, %v193_v15 }
 0x1b5   :  { %196 = vst.msk [vmem:[%s311_s4] sm:$0xff] %vm114_vm1, %v188_v17 }

// kernel: forward.6
= control target key start
LH: loop header
LB: loop body
LE: loop exit
PB: predicated region body
PF: predicated region fallthrough
CT: control target
= control target key end

     0   :  { %vm27_vm0 = vcmask 130048   ;;  %vm120_vm1 = vcmask 261120   ;;  %s470_s1 = inlined_call_operand.vmem [shape: f32[16,32], index: 1, kind: input, shape index: {}]   ;;  %s471_s0 = inlined_call_operand.vmem [shape: f32[16,16], index: 0, kind: input, shape index: {}]   ;;  %s472_s2 = inlined_call_operand.vmem [shape: f32[32,32], index: 2, kind: input, shape index: {}]   ;;  %s473_s4 = inlined_call_operand.vmem [shape: f32[32,16], index: 4, kind: input, shape index: {}]   ;;  %s474_s3 = inlined_call_operand.vmem [shape: f32[1,32], index: 3, kind: input, shape index: {}]   ;;  %s475_s5 = inlined_call_operand.vmem [shape: f32[1,16], index: 5, kind: input, shape index: {}]   ;;  %s476_s6 = inlined_call_operand.vmem [shape: f32[16,16], index: 6, kind: output, shape index: {}]  }
   0x1   :  { %v25_v0 = vld [vmem:[%s470_s1] sm:$0xff]  ;;  %v26_v1 = vld [vmem:[%s470_s1 + $0x8] sm:$0xff]  ;;  %v111_v7 = vld [vmem:[%s472_s2 + $0x10] sm:$0xff] }
   0x2   :  { %v23_v2 = vld [vmem:[%s471_s0] sm:$0xff]  ;;  %v359_v3 = vpack.c.bf16 %v26_v1, %v25_v0  ;;  %v110_v5 = vld [vmem:[%s472_s2 + $0x8] sm:$0xff]  ;;  %v112_v8 = vld [vmem:[%s472_s2 + $0x18] sm:$0xff] }
   0x3   :  { %334 = vmatprep.mubr.msk.f32.mxu0 %vm27_vm0, %v23_v2  ;;  %v109_v4 = vld [vmem:[%s472_s2] sm:$0xff]  ;;  %v367_v9 = vpack.c.bf16 %v112_v8, %v111_v7  ;;  %v24_v10 = vld [vmem:[%s471_s0 + $0x8] sm:$0xff]  ;;  %v204_v16 = vld [vmem:[%s473_s4 + $0x10] sm:$0xff] }
   0x4   :  { %v363_v6 = vpack.c.bf16 %v110_v5, %v109_v4  ;;  %360 = vmatprep.subr.bf16.mxu0 %v359_v3  ;;  %v202_v11 = vld [vmem:[%s473_s4] sm:$0xff]  ;;  %v203_v12 = vld [vmem:[%s473_s4 + $0x8] sm:$0xff]  ;;  %v205_v17 = vld [vmem:[%s473_s4 + $0x18] sm:$0xff] }
   0x5   :  { %362 = vmatpush3.bf16.msra.mxu0 %v359_v3  ;;  %v371_v13 = vpack.c.bf16 %v203_v12, %v202_v11  ;;  %v375_v18 = vpack.c.bf16 %v205_v17, %v204_v16  ;;  %v308_v19 = vld [vmem:[%s474_s3] ss:$0 sm:$0xff] }
   0x6   :  { %364 = vmatprep.subr.bf16.mxu1 %v363_v6  ;;  %v311_v24 = vld [vmem:[%s475_s5] ss:$0 sm:$0xff] }
   0x7   :  { %366 = vmatpush3.bf16.msra.mxu1 %v363_v6  ;;  %372 = vmatprep.subr.bf16.mxu0 %v371_v13 }
   0x8   :  { %368 = vmatprep.subr.bf16.mxu1 %v367_v9  ;;  %335 = vmatmul.mubr.msk.f32.vlgmr.msra.gmra.mrb[0].mxu0 %vm27_vm0, %v24_v10 }
   0x9   :  { %374 = vmatpush3.bf16.msra.mxu0 %v371_v13 }
   0xa   :  { %376 = vmatprep.subr.bf16.mxu0 %v375_v18 }
   0xb   :  { %370 = vmatpush3.bf16.msra.mxu1 %v367_v9 }
   0xd   :  { %378 = vmatpush3.bf16.msra.mxu0 %v375_v18 }
  0xdb   :  { %v336_v14 = vpop.f32.mrb[0].mxu0 }
  0xdc   :  { %v100_v15 = vpop.f32.mrb[1].mxu0 }
  0xdd   :  { %345 = vmatprep.mubr.msk.f32.mxu1 %vm120_vm1, %v100_v15 }
  0xde   :  { %346 = vmatmul.mubr.msk.f32.vlgmr.msra.gmra.mrb[0].mxu1 %vm120_vm1, %v336_v14 }
 0x1b1   :  { %v347_v20 = vpop.f32.mrb[0].mxu1 }
 0x1b2   :  { %v193_v21 = vpop.f32.mrb[1].mxu1  ;;  %v199_v23 = vadd.f32 %v347_v20, %v308_v19 }
 0x1b3   :  { %v194_v22 = vadd.f32 %v308_v19, %v193_v21 }
 0x1b5   :  { %356 = vmatprep.mubr.msk.f32.mxu0 %vm120_vm1, %v194_v22 }
 0x1b6   :  { %357 = vmatmul.mubr.msk.f32.vlgmr.msra.gmra.mrb[2].mxu0 %vm120_vm1, %v199_v23 }
 0x289   :  { %v358_v25 = vpop.f32.mrb[2].mxu0 }
 0x28a   :  { %v291_v26 = vadd.f32 %v358_v25, %v311_v24  ;;  %v285_v27 = vpop.f32.mrb[3].mxu0 }
 0x28b   :  { %v286_v28 = vadd.f32 %v311_v24, %v285_v27 }
 0x28c   :  { %vm295_vm2 = vcmp.gt.f32.partialorder %v291_v26, 0.0  ;;  %v297_v29 = vmul.f32 0.01, %v291_v26 }
 0x28d   :  { %vm294_vm3 = vcmp.gt.f32.partialorder %v286_v28, 0.0  ;;  %v296_v30 = vmul.f32 0.01, %v286_v28 }
 0x28e   :  { %v299_v31 = vsel %vm295_vm2, %v291_v26, %v297_v29 }
 0x28f   :  { %301 = vst.msk [vmem:[%s476_s6 + $0x8] sm:$0xff] %vm27_vm0, %v299_v31  ;;  %v298_v32 = vsel %vm294_vm3, %v286_v28, %v296_v30 }
 0x290   :  { %300 = vst.msk [vmem:[%s476_s6] sm:$0xff] %vm27_vm0, %v298_v32 }

// kernel: forward.7
= control target key start
LH: loop header
LB: loop body
LE: loop exit
PB: predicated region body
PF: predicated region fallthrough
CT: control target
= control target key end

     0   :  { %vm45_vm0 = vcmask 130048   ;;  %vm417_vm5 = vcmask 64512   ;;  %vm520_vm6 = vcmask 1043456   ;;  %vm513_vm9 = vcmask 31744   ;;  %s830_s1 = inlined_call_operand.vmem [shape: f32[16,16], index: 1, kind: input, shape index: {}]   ;;  %s831_s0 = inlined_call_operand.vmem [shape: f32[16,16], index: 0, kind: input, shape index: {}]   ;;  %s832_s2 = inlined_call_operand.vmem [shape: f32[16,16], index: 2, kind: input, shape index: {}]   ;;  %s833_s4 = inlined_call_operand.vmem [shape: f32[16,16], index: 4, kind: input, shape index: {}]   ;;  %s834_s3 = inlined_call_operand.vmem [shape: f32[1,16], index: 3, kind: input, shape index: {}]   ;;  %s835_s6 = inlined_call_operand.vmem [shape: f32[16,8], index: 6, kind: input, shape index: {}]   ;;  %s836_s5 = inlined_call_operand.vmem [shape: f32[1,16], index: 5, kind: input, shape index: {}]   ;;  %s837_s8 = inlined_call_operand.vmem [shape: f32[8,4], index: 8, kind: input, shape index: {}]   ;;  %s838_s7 = inlined_call_operand.vmem [shape: f32[1,8], index: 7, kind: input, shape index: {}]   ;;  %s839_s10 = inlined_call_operand.vmem [shape: f32[4,2], index: 10, kind: input, shape index: {}]   ;;  %s840_s9 = inlined_call_operand.vmem [shape: f32[1,4], index: 9, kind: input, shape index: {}]   ;;  %s841_s11 = inlined_call_operand.vmem [shape: f32[1,2], index: 11, kind: input, shape index: {}]   ;;  %s842_s12 = inlined_call_operand.vmem [shape: f32[16,2], index: 12, kind: output, shape index: {}]  }
   0x1   :  { %v43_v0 = vld [vmem:[%s830_s1] sm:$0xff]  ;;  %v44_v1 = vld [vmem:[%s830_s1 + $0x8] sm:$0xff]  ;;  %vm599_vm10 = vcmask 15360  }
   0x2   :  { %v41_v2 = vld [vmem:[%s831_s0] sm:$0xff]  ;;  %v684_v3 = vpack.c.bf16 %v44_v1, %v43_v0  ;;  %v128_v5 = vld [vmem:[%s832_s2 + $0x8] sm:$0xff] }
   0x3   :  { %650 = vmatprep.mubr.msk.f32.mxu0 %vm45_vm0, %v41_v2  ;;  %v127_v4 = vld [vmem:[%s832_s2] sm:$0xff]  ;;  %v42_v7 = vld [vmem:[%s831_s0 + $0x8] sm:$0xff] }
   0x4   :  { %v688_v6 = vpack.c.bf16 %v128_v5, %v127_v4  ;;  %685 = vmatprep.subr.bf16.mxu0 %v684_v3  ;;  %v217_v10 = vld [vmem:[%s833_s4] sm:$0xff]  ;;  %v218_v11 = vld [vmem:[%s833_s4 + $0x8] sm:$0xff] }
   0x5   :  { %687 = vmatpush3.bf16.msra.mxu0 %v684_v3  ;;  %v692_v12 = vpack.c.bf16 %v218_v11, %v217_v10  ;;  %v608_v13 = vld [vmem:[%s834_s3] ss:$0 sm:$0xff]  ;;  %v314_v19 = vld [vmem:[%s835_s6 + $0x8] sm:$0xff] }
   0x6   :  { %689 = vmatprep.subr.bf16.mxu1 %v688_v6  ;;  %v313_v18 = vld [vmem:[%s835_s6] sm:$0xff] }
   0x7   :  { %691 = vmatpush3.bf16.msra.mxu1 %v688_v6  ;;  %693 = vmatprep.subr.bf16.mxu0 %v692_v12  ;;  %v696_v20 = vpack.c.bf16 %v314_v19, %v313_v18  ;;  %v611_v21 = vld [vmem:[%s836_s5] ss:$0 sm:$0xff] }
   0x8   :  { %651 = vmatmul.mubr.msk.f32.vlgmr.msra.gmra.mrb[0].mxu0 %vm45_vm0, %v42_v7  ;;  %v409_v30 = vld [vmem:[%s837_s8] sm:$0xff] }
   0x9   :  { %695 = vmatpush3.bf16.msra.mxu0 %v692_v12  ;;  %697 = vmatprep.subr.bf16.mxu1 %v696_v20  ;;  %v614_v31 = vld [vmem:[%s838_s7] ss:$0 sm:$0xff] }
   0xa   :  { %674 = vmatprep.subr.mxu0 %v409_v30  ;;  %v505_v40 = vld [vmem:[%s839_s10] sm:$0xf] }
   0xb   :  { %v617_v41 = vld [vmem:[%s840_s9] ss:$0 sm:$0xff] }
   0xc   :  { %v620_v50 = vld [vmem:[%s841_s11] ss:$0 sm:$0xff] }
  0xdb   :  { %v652_v8 = vpop.f32.mrb[0].mxu0 }
  0xdc   :  { %v118_v9 = vpop.f32.mrb[1].mxu0 }
  0xdd   :  { %657 = vmatprep.mubr.msk.f32.mxu1 %vm45_vm0, %v118_v9 }
  0xde   :  { %658 = vmatmul.mubr.msk.f32.vlgmr.msra.gmra.mrb[0].mxu1 %vm45_vm0, %v652_v8 }
  0xdf   :  { %699 = vmatpush3.bf16.msra.mxu1 %v696_v20 }
  0xe0   :  { %679 = vmatprep.subr.msk.mxu1 %vm520_vm6, %v505_v40 }
 0x1b1   :  { %v659_v14 = vpop.f32.mrb[0].mxu1 }
 0x1b2   :  { %v208_v15 = vpop.f32.mrb[1].mxu1  ;;  %v214_v17 = vadd.f32 %v659_v14, %v608_v13 }
 0x1b3   :  { %v209_v16 = vadd.f32 %v608_v13, %v208_v15 }
 0x1b5   :  { %664 = vmatprep.mubr.msk.f32.mxu0 %vm45_vm0, %v209_v16 }
 0x1b6   :  { %665 = vmatmul.mubr.msk.f32.vlgmr.msra.gmra.mrb[2].mxu0 %vm45_vm0, %v214_v17 }
 0x1b7   :  { %675 = vmatpush3.msra.mxu0 %v409_v30 }
 0x289   :  { %v666_v22 = vpop.f32.mrb[2].mxu0 }
 0x28a   :  { %v304_v23 = vadd.f32 %v666_v22, %v611_v21  ;;  %v298_v24 = vpop.f32.mrb[3].mxu0 }
 0x28b   :  { %v299_v25 = vadd.f32 %v611_v21, %v298_v24 }
 0x28c   :  { %v310_v26 = vmul.f32 0.01, %v304_v23  ;;  %vm308_vm1 = vcmp.gt.f32.partialorder %v304_v23, 0.0 }
 0x28d   :  { %vm307_vm2 = vcmp.gt.f32.partialorder %v299_v25, 0.0  ;;  %v309_v27 = vmul.f32 0.01, %v299_v25 }
 0x28e   :  { %v312_v29 = vsel %vm308_vm1, %v304_v23, %v310_v26 }
 0x28f   :  { %v311_v28 = vsel %vm307_vm2, %v299_v25, %v309_v27 }
 0x290   :  { %671 = vmatprep.mubr.msk.f32.mxu1 %vm45_vm0, %v311_v28 }
 0x291   :  { %672 = vmatmul.mubr.msk.f32.vlgmr.msra.gmra.mrb[2].mxu1 %vm45_vm0, %v312_v29 }
 0x292   :  { %680 = vmatpush3.msk.msra.mxu1 %vm520_vm6, %v505_v40 }
 0x364   :  { %v673_v32 = vpop.f32.mrb[2].mxu1 }
 0x365   :  { %v400_v33 = vadd.f32 %v673_v32, %v614_v31  ;;  %v394_v34 = vpop.f32.mrb[3].mxu1 }
 0x366   :  { %v395_v35 = vadd.f32 %v614_v31, %v394_v34 }
 0x367   :  { %v406_v36 = vmul.f32 0.01, %v400_v33  ;;  %vm404_vm3 = vcmp.gt.f32.partialorder %v400_v33, 0.0 }
 0x368   :  { %vm403_vm4 = vcmp.gt.f32.partialorder %v395_v35, 0.0  ;;  %v405_v37 = vmul.f32 0.01, %v395_v35 }
 0x369   :  { %v408_v39 = vsel %vm404_vm3, %v400_v33, %v406_v36 }
 0x36a   :  { %v407_v38 = vsel %vm403_vm4, %v395_v35, %v405_v37 }
 0x36b   :  { %676 = vmatprep.mubr.msk.f32.mxu0 %vm417_vm5, %v407_v38 }
 0x36c   :  { %677 = vmatmul.mubr.msk.f32.vlgmr.msra.gmra.mrb[4].mxu0 %vm417_vm5, %v408_v39 }
 0x43f   :  { %v678_v42 = vpop.f32.mrb[4].mxu0 }
 0x440   :  { %v496_v43 = vadd.f32 %v678_v42, %v617_v41  ;;  %v490_v44 = vpop.f32.mrb[5].mxu0 }
 0x441   :  { %v491_v45 = vadd.f32 %v617_v41, %v490_v44 }
 0x442   :  { %v502_v46 = vmul.f32 0.01, %v496_v43  ;;  %vm500_vm7 = vcmp.gt.f32.partialorder %v496_v43, 0.0 }
 0x443   :  { %vm499_vm8 = vcmp.gt.f32.partialorder %v491_v45, 0.0  ;;  %v501_v47 = vmul.f32 0.01, %v491_v45 }
 0x444   :  { %v504_v49 = vsel %vm500_vm7, %v496_v43, %v502_v46 }
 0x445   :  { %v503_v48 = vsel %vm499_vm8, %v491_v45, %v501_v47 }
 0x446   :  { %681 = vmatprep.mubr.msk.f32.mxu1 %vm513_vm9, %v503_v48 }
 0x447   :  { %682 = vmatmul.mubr.msk.f32.vlgmr.msra.gmra.mrb[4].mxu1 %vm513_vm9, %v504_v49 }
 0x51a   :  { %v683_v51 = vpop.f32.mrb[4].mxu1 }
 0x51b   :  { %v596_v52 = vadd.f32 %v683_v51, %v620_v50  ;;  %v590_v53 = vpop.f32.mrb[5].mxu1 }
 0x51c   :  { %v591_v54 = vadd.f32 %v620_v50, %v590_v53 }
 0x51d   :  { %601 = vst.msk [vmem:[%s842_s12 + $0x8] sm:$0xff] %vm599_vm10, %v596_v52 }
 0x51e   :  { %600 = vst.msk [vmem:[%s842_s12] sm:$0xff] %vm599_vm10, %v591_v54 }

// kernel: forward.4
= control target key start
LH: loop header
LB: loop body
LE: loop exit
PB: predicated region body
PF: predicated region fallthrough
CT: control target
= control target key end

     0   :  { %vm246_vm0 = vcmask 64512   ;;  %vm795_vm2 = vcmask 261120   ;;  %s2063_s1 = inlined_call_operand.vmem [shape: f32[1544,32], index: 1, kind: input, shape index: {}]   ;;  %s2064_s0 = inlined_call_operand.vmem [shape: f32[16,1544], index: 0, kind: input, shape index: {}]   ;;  %s2065_s3 = inlined_call_operand.vmem [shape: f32[32,32], index: 3, kind: input, shape index: {}]   ;;  %s2066_s2 = inlined_call_operand.vmem [shape: f32[1,32], index: 2, kind: input, shape index: {}]   ;;  %s2067_s4 = inlined_call_operand.vmem [shape: f32[1,32], index: 4, kind: input, shape index: {}]   ;;  %s2068_s5 = inlined_call_operand.vmem [shape: f32[16,32], index: 5, kind: output, shape index: {}]  }
   0x1   :  { %v62_v0 = vld [vmem:[%s2063_s1 + $0x80] sm:$0xff]  ;;  %v63_v1 = vld [vmem:[%s2063_s1 + $0x88] sm:$0xff]  ;;  %v64_v11 = vld [vmem:[%s2063_s1 + $0x90] sm:$0xff] }
   0x2   :  { %v46_v2 = vld [vmem:[%s2063_s1] sm:$0xff]  ;;  %v1148_v3 = vpack.c.bf16 %v63_v1, %v62_v0  ;;  %v47_v4 = vld [vmem:[%s2063_s1 + $0x8] sm:$0xff]  ;;  %v65_v13 = vld [vmem:[%s2063_s1 + $0x98] sm:$0xff] }
   0x3   :  { %v94_v5 = vld [vmem:[%s2063_s1 + $0x180] sm:$0xff]  ;;  %v95_v6 = vld [vmem:[%s2063_s1 + $0x188] sm:$0xff]  ;;  %v1150_v7 = vpack.c.bf16 %v47_v4, %v46_v2  ;;  %v48_v14 = vld [vmem:[%s2063_s1 + $0x10] sm:$0xff]  ;;  %v1152_v16 = vpack.c.bf16 %v65_v13, %v64_v11 }
   0x4   :  { %v1180_v8 = vpack.c.bf16 %v95_v6, %v94_v5  ;;  %v78_v9 = vld [vmem:[%s2063_s1 + $0x100] sm:$0xff]  ;;  %v79_v10 = vld [vmem:[%s2063_s1 + $0x108] sm:$0xff]  ;;  %1149 = vmatprep.subr.bf16.mxu0 %v1148_v3  ;;  %v49_v15 = vld [vmem:[%s2063_s1 + $0x18] sm:$0xff] }
   0x5   :  { %v1182_v12 = vpack.c.bf16 %v79_v10, %v78_v9  ;;  %1151 = vmatpush3.bf16.msra.mxu0 %v1150_v7  ;;  %v1154_v17 = vpack.c.bf16 %v49_v15, %v48_v14  ;;  %v96_v18 = vld [vmem:[%s2063_s1 + $0x190] sm:$0xff]  ;;  %v97_v19 = vld [vmem:[%s2063_s1 + $0x198] sm:$0xff]  ;;  %v66_v23 = vld [vmem:[%s2063_s1 + $0xa0] sm:$0xff] }
   0x6   :  { %1181 = vmatprep.subr.bf16.mxu1 %v1180_v8  ;;  %v80_v20 = vld [vmem:[%s2063_s1 + $0x110] sm:$0xff]  ;;  %v1184_v21 = vpack.c.bf16 %v97_v19, %v96_v18  ;;  %v81_v22 = vld [vmem:[%s2063_s1 + $0x118] sm:$0xff]  ;;  %v67_v24 = vld [vmem:[%s2063_s1 + $0xa8] sm:$0xff]  ;;  %1153 = vmatprep.subr.bf16.mxu0 %v1152_v16 }
   0x7   :  { %1183 = vmatpush3.bf16.msra.mxu1 %v1182_v12  ;;  %v1186_v25 = vpack.c.bf16 %v81_v22, %v80_v20  ;;  %v1156_v26 = vpack.c.bf16 %v67_v24, %v66_v23  ;;  %v50_v27 = vld [vmem:[%s2063_s1 + $0x20] sm:$0xff]  ;;  %v51_v28 = vld [vmem:[%s2063_s1 + $0x28] sm:$0xff]  ;;  %v68_v35 = vld [vmem:[%s2063_s1 + $0xb0] sm:$0xff] }
   0x8   :  { %v98_v29 = vld [vmem:[%s2063_s1 + $0x1a0] sm:$0xff]  ;;  %1185 = vmatprep.subr.bf16.mxu1 %v1184_v21  ;;  %v99_v30 = vld [vmem:[%s2063_s1 + $0x1a8] sm:$0xff]  ;;  %v1158_v33 = vpack.c.bf16 %v51_v28, %v50_v27  ;;  %v69_v36 = vld [vmem:[%s2063_s1 + $0xb8] sm:$0xff] }
   0x9   :  { %v82_v31 = vld [vmem:[%s2063_s1 + $0x120] sm:$0xff]  ;;  %v83_v32 = vld [vmem:[%s2063_s1 + $0x128] sm:$0xff]  ;;  %1155 = vmatpush3.bf16.msra.mxu0 %v1154_v17  ;;  %v1188_v34 = vpack.c.bf16 %v99_v30, %v98_v29  ;;  %v52_v37 = vld [vmem:[%s2063_s1 + $0x30] sm:$0xff]  ;;  %v1160_v39 = vpack.c.bf16 %v69_v36, %v68_v35 }
   0xa   :  { %1157 = vmatprep.subr.bf16.mxu0 %v1156_v26  ;;  %v1190_v38 = vpack.c.bf16 %v83_v32, %v82_v31  ;;  %v53_v40 = vld [vmem:[%s2063_s1 + $0x38] sm:$0xff]  ;;  %v100_v41 = vld [vmem:[%s2063_s1 + $0x1b0] sm:$0xff]  ;;  %v70_v46 = vld [vmem:[%s2063_s1 + $0xc0] sm:$0xff] }
   0xb   :  { %1187 = vmatpush3.bf16.msra.mxu1 %v1186_v25  ;;  %v101_v42 = vld [vmem:[%s2063_s1 + $0x1b8] sm:$0xff]  ;;  %v84_v44 = vld [vmem:[%s2063_s1 + $0x130] sm:$0xff]  ;;  %v71_v47 = vld [vmem:[%s2063_s1 + $0xc8] sm:$0xff]  ;;  %v1162_v48 = vpack.c.bf16 %v53_v40, %v52_v37 }
   0xc   :  { %1189 = vmatprep.subr.bf16.mxu1 %v1188_v34  ;;  %v1192_v43 = vpack.c.bf16 %v101_v42, %v100_v41  ;;  %v85_v45 = vld [vmem:[%s2063_s1 + $0x138] sm:$0xff]  ;;  %v102_v49 = vld [vmem:[%s2063_s1 + $0x1c0] sm:$0xff]  ;;  %v103_v50 = vld [vmem:[%s2063_s1 + $0x1c8] sm:$0xff]  ;;  %v1164_v52 = vpack.c.bf16 %v71_v47, %v70_v46 }
   0xd   :  { %1159 = vmatpush3.bf16.msra.mxu0 %v1158_v33  ;;  %v1194_v51 = vpack.c.bf16 %v85_v45, %v84_v44  ;;  %v54_v53 = vld [vmem:[%s2063_s1 + $0x40] sm:$0xff]  ;;  %v55_v54 = vld [vmem:[%s2063_s1 + $0x48] sm:$0xff]  ;;  %v1196_v56 = vpack.c.bf16 %v103_v50, %v102_v49  ;;  %v72_v58 = vld [vmem:[%s2063_s1 + $0xd0] sm:$0xff] }
   0xe   :  { %1161 = vmatprep.subr.bf16.mxu0 %v1160_v39  ;;  %v86_v55 = vld [vmem:[%s2063_s1 + $0x140] sm:$0xff]  ;;  %v87_v57 = vld [vmem:[%s2063_s1 + $0x148] sm:$0xff]  ;;  %v73_v59 = vld [vmem:[%s2063_s1 + $0xd8] sm:$0xff]  ;;  %v1166_v62 = vpack.c.bf16 %v55_v54, %v54_v53 }
   0xf   :  { %1191 = vmatpush3.bf16.msra.mxu1 %v1190_v38  ;;  %v104_v60 = vld [vmem:[%s2063_s1 + $0x1d0] sm:$0xff]  ;;  %v105_v61 = vld [vmem:[%s2063_s1 + $0x1d8] sm:$0xff]  ;;  %v1198_v63 = vpack.c.bf16 %v87_v57, %v86_v55  ;;  %v1168_v0 = vpack.c.bf16 %v73_v59, %v72_v58  ;;  %v74_v6 = vld [vmem:[%s2063_s1 + $0xe0] sm:$0xff] }
  0x10   :  { %1193 = vmatprep.subr.bf16.mxu1 %v1192_v43  ;;  %v56_v1 = vld [vmem:[%s2063_s1 + $0x50] sm:$0xff]  ;;  %v57_v2 = vld [vmem:[%s2063_s1 + $0x58] sm:$0xff]  ;;  %v1200_v4 = vpack.c.bf16 %v105_v61, %v104_v60  ;;  %v75_v7 = vld [vmem:[%s2063_s1 + $0xe8] sm:$0xff] }
  0x11   :  { %1163 = vmatpush3.bf16.msra.mxu0 %v1162_v48  ;;  %v88_v3 = vld [vmem:[%s2063_s1 + $0x150] sm:$0xff]  ;;  %v89_v5 = vld [vmem:[%s2063_s1 + $0x158] sm:$0xff]  ;;  %v106_v8 = vld [vmem:[%s2063_s1 + $0x1e0] sm:$0xff]  ;;  %v1170_v10 = vpack.c.bf16 %v57_v2, %v56_v1  ;;  %v1172_v14 = vpack.c.bf16 %v75_v7, %v74_v6 }
  0x12   :  { %1165 = vmatprep.subr.bf16.mxu0 %v1164_v52  ;;  %v107_v9 = vld [vmem:[%s2063_s1 + $0x1e8] sm:$0xff]  ;;  %v58_v11 = vld [vmem:[%s2063_s1 + $0x60] sm:$0xff]  ;;  %v1202_v13 = vpack.c.bf16 %v89_v5, %v88_v3  ;;  %v76_v19 = vld [vmem:[%s2063_s1 + $0xf0] sm:$0xff] }
  0x13   :  { %1195 = vmatpush3.bf16.msra.mxu1 %v1194_v51  ;;  %v59_v12 = vld [vmem:[%s2063_s1 + $0x68] sm:$0xff]  ;;  %v90_v15 = vld [vmem:[%s2063_s1 + $0x160] sm:$0xff]  ;;  %v1204_v18 = vpack.c.bf16 %v107_v9, %v106_v8  ;;  %v77_v20 = vld [vmem:[%s2063_s1 + $0xf8] sm:$0xff] }
  0x14   :  { %1197 = vmatprep.subr.bf16.mxu1 %v1196_v56  ;;  %v91_v16 = vld [vmem:[%s2063_s1 + $0x168] sm:$0xff]  ;;  %v23_v21 = vld [vmem:[%s2064_s0 + $0x18] sm:$0xff]  ;;  %v108_v22 = vld [vmem:[%s2063_s1 + $0x1f0] sm:$0xff]  ;;  %v1174_v24 = vpack.c.bf16 %v59_v12, %v58_v11  ;;  %v1176_v26 = vpack.c.bf16 %v77_v20, %v76_v19 }
  0x15   :  { %1167 = vmatpush3.bf16.msra.mxu0 %v1166_v62  ;;  %v21_v17 = vld [vmem:[%s2064_s0 + $0x8] sm:$0xff]  ;;  %v109_v23 = vld [vmem:[%s2063_s1 + $0x1f8] sm:$0xff]  ;;  %392 = vmatprep.mubr.f32.mxu1 %v23_v21  ;;  %v1206_v25 = vpack.c.bf16 %v91_v16, %v90_v15  ;;  %v60_v27 = vld [vmem:[%s2063_s1 + $0x70] sm:$0xff] }
  0x16   :  { %1169 = vmatprep.subr.bf16.mxu0 %v1168_v0  ;;  %317 = vmatprep.mubr.f32.mxu0 %v21_v17  ;;  %v61_v28 = vld [vmem:[%s2063_s1 + $0x78] sm:$0xff]  ;;  %v92_v29 = vld [vmem:[%s2063_s1 + $0x170] sm:$0xff]  ;;  %v1208_v30 = vpack.c.bf16 %v109_v23, %v108_v22  ;;  %v126_v32 = vld [vmem:[%s2063_s1 + $0x280] sm:$0xff] }
  0x17   :  { %1199 = vmatpush3.bf16.msra.mxu1 %v1198_v63  ;;  %v93_v31 = vld [vmem:[%s2063_s1 + $0x178] sm:$0xff]  ;;  %v127_v33 = vld [vmem:[%s2063_s1 + $0x288] sm:$0xff]  ;;  %v158_v34 = vld [vmem:[%s2063_s1 + $0x380] sm:$0xff]  ;;  %v1178_v36 = vpack.c.bf16 %v61_v28, %v60_v27 }
  0x18   :  { %1201 = vmatprep.subr.bf16.mxu1 %v1200_v4  ;;  %v159_v35 = vld [vmem:[%s2063_s1 + $0x388] sm:$0xff]  ;;  %v1210_v37 = vpack.c.bf16 %v93_v31, %v92_v29  ;;  %v1212_v38 = vpack.c.bf16 %v127_v33, %v126_v32  ;;  %v110_v39 = vld [vmem:[%s2063_s1 + $0x200] sm:$0xff]  ;;  %v128_v44 = vld [vmem:[%s2063_s1 + $0x290] sm:$0xff] }
  0x19   :  { %1171 = vmatpush3.bf16.msra.mxu0 %v1170_v10  ;;  %v111_v40 = vld [vmem:[%s2063_s1 + $0x208] sm:$0xff]  ;;  %v142_v41 = vld [vmem:[%s2063_s1 + $0x300] sm:$0xff]  ;;  %v1244_v42 = vpack.c.bf16 %v159_v35, %v158_v34  ;;  %v129_v45 = vld [vmem:[%s2063_s1 + $0x298] sm:$0xff] }
  0x1a   :  { %1173 = vmatprep.subr.bf16.mxu0 %v1172_v14  ;;  %v143_v43 = vld [vmem:[%s2063_s1 + $0x308] sm:$0xff]  ;;  %v160_v46 = vld [vmem:[%s2063_s1 + $0x390] sm:$0xff]  ;;  %v161_v47 = vld [vmem:[%s2063_s1 + $0x398] sm:$0xff]  ;;  %v1214_v49 = vpack.c.bf16 %v111_v40, %v110_v39  ;;  %v1216_v52 = vpack.c.bf16 %v129_v45, %v128_v44 }
  0x1b   :  { %1203 = vmatpush3.bf16.msra.mxu1 %v1202_v13  ;;  %v20_v48 = vld [vmem:[%s2064_s0] sm:$0xff]  ;;  %v22_v50 = vld [vmem:[%s2064_s0 + $0x10] sm:$0xff]  ;;  %v1246_v51 = vpack.c.bf16 %v143_v43, %v142_v41  ;;  %v113_v54 = vld [vmem:[%s2063_s1 + $0x218] sm:$0xff]  ;;  %v1248_v56 = vpack.c.bf16 %v161_v47, %v160_v46 }
  0x1c   :  { %1205 = vmatprep.subr.bf16.mxu1 %v1204_v18  ;;  %v112_v53 = vld [vmem:[%s2063_s1 + $0x210] sm:$0xff]  ;;  %v145_v57 = vld [vmem:[%s2063_s1 + $0x318] sm:$0xff]  ;;  %v130_v58 = vld [vmem:[%s2063_s1 + $0x2a0] sm:$0xff] }
  0x1d   :  { %1175 = vmatpush3.bf16.msra.mxu0 %v1174_v24  ;;  %v144_v55 = vld [vmem:[%s2063_s1 + $0x310] sm:$0xff]  ;;  %v131_v59 = vld [vmem:[%s2063_s1 + $0x2a8] sm:$0xff]  ;;  %v162_v60 = vld [vmem:[%s2063_s1 + $0x3a0] sm:$0xff]  ;;  %v1218_v62 = vpack.c.bf16 %v113_v54, %v112_v53 }
  0x1e   :  { %1177 = vmatprep.subr.bf16.mxu0 %v1176_v26  ;;  %v163_v61 = vld [vmem:[%s2063_s1 + $0x3a8] sm:$0xff]  ;;  %v1250_v63 = vpack.c.bf16 %v145_v57, %v144_v55  ;;  %v1220_v0 = vpack.c.bf16 %v131_v59, %v130_v58  ;;  %v114_v1 = vld [vmem:[%s2063_s1 + $0x220] sm:$0xff]  ;;  %v132_v6 = vld [vmem:[%s2063_s1 + $0x2b0] sm:$0xff] }
  0x1f   :  { %1207 = vmatpush3.bf16.msra.mxu1 %v1206_v25  ;;  %v115_v2 = vld [vmem:[%s2063_s1 + $0x228] sm:$0xff]  ;;  %v146_v3 = vld [vmem:[%s2063_s1 + $0x320] sm:$0xff]  ;;  %v1252_v4 = vpack.c.bf16 %v163_v61, %v162_v60  ;;  %v133_v7 = vld [vmem:[%s2063_s1 + $0x2b8] sm:$0xff] }
  0x20   :  { %1209 = vmatprep.subr.bf16.mxu1 %v1208_v30  ;;  %v147_v5 = vld [vmem:[%s2063_s1 + $0x328] sm:$0xff]  ;;  %v164_v8 = vld [vmem:[%s2063_s1 + $0x3b0] sm:$0xff]  ;;  %v165_v9 = vld [vmem:[%s2063_s1 + $0x3b8] sm:$0xff]  ;;  %v1222_v10 = vpack.c.bf16 %v115_v2, %v114_v1  ;;  %v1224_v15 = vpack.c.bf16 %v133_v7, %v132_v6 }
  0x21   :  { %1179 = vmatpush3.bf16.msra.mxu0 %v1178_v36  ;;  %v116_v11 = vld [vmem:[%s2063_s1 + $0x230] sm:$0xff]  ;;  %v117_v12 = vld [vmem:[%s2063_s1 + $0x238] sm:$0xff]  ;;  %v1254_v14 = vpack.c.bf16 %v147_v5, %v146_v3  ;;  %v33_v18 = vld [vmem:[%s2064_s0 + $0x68] sm:$0xff]  ;;  %v1256_v19 = vpack.c.bf16 %v165_v9, %v164_v8 }
  0x22   :  { %1213 = vmatprep.subr.bf16.mxu0 %v1212_v38  ;;  %v148_v13 = vld [vmem:[%s2063_s1 + $0x330] sm:$0xff]  ;;  %v149_v16 = vld [vmem:[%s2063_s1 + $0x338] sm:$0xff]  ;;  %v134_v20 = vld [vmem:[%s2063_s1 + $0x2c0] sm:$0xff]  ;;  %v1226_v25 = vpack.c.bf16 %v117_v12, %v116_v11 }
  0x23   :  { %1211 = vmatpush3.bf16.msra.mxu1 %v1210_v37  ;;  %v34_v17 = vld [vmem:[%s2064_s0 + $0x70] sm:$0xff]  ;;  %v135_v21 = vld [vmem:[%s2063_s1 + $0x2c8] sm:$0xff]  ;;  %v36_v22 = vld [vmem:[%s2064_s0 + $0x80] sm:$0xff]  ;;  %v1258_v29 = vpack.c.bf16 %v149_v16, %v148_v13 }
  0x24   :  { %1245 = vmatprep.subr.bf16.mxu1 %v1244_v42  ;;  %318 = vmatmul.mubr.f32.vlgmr.msra.gmra.mrb[0].mxu0 %v20_v48  ;;  %v166_v23 = vld [vmem:[%s2063_s1 + $0x3c0] sm:$0xff]  ;;  %v167_v24 = vld [vmem:[%s2063_s1 + $0x3c8] sm:$0xff]  ;;  %v35_v28 = vld [vmem:[%s2064_s0 + $0x78] sm:$0xff]  ;;  %v1228_v30 = vpack.c.bf16 %v135_v21, %v134_v20 }
  0x25   :  { %1215 = vmatpush3.bf16.msra.mxu0 %v1214_v49  ;;  %322 = vmatprep.mubr.f32.mxu0 %v34_v17  ;;  %v118_v26 = vld [vmem:[%s2063_s1 + $0x240] sm:$0xff]  ;;  %v119_v27 = vld [vmem:[%s2063_s1 + $0x248] sm:$0xff]  ;;  %v1260_v34 = vpack.c.bf16 %v167_v24, %v166_v23  ;;  %v136_v35 = vld [vmem:[%s2063_s1 + $0x2d0] sm:$0xff] }
  0x26   :  { %393 = vmatmul.mubr.f32.vlgmr.msra.gmra.mrb[0].mxu1 %v22_v50  ;;  %1217 = vmatprep.subr.bf16.mxu0 %v1216_v52  ;;  %v150_v31 = vld [vmem:[%s2063_s1 + $0x340] sm:$0xff]  ;;  %v151_v32 = vld [vmem:[%s2063_s1 + $0x348] sm:$0xff]  ;;  %v137_v36 = vld [vmem:[%s2063_s1 + $0x2d8] sm:$0xff]  ;;  %v1230_v40 = vpack.c.bf16 %v119_v27, %v118_v26 }
  0x27   :  { %1247 = vmatpush3.bf16.msra.mxu1 %v1246_v51  ;;  %397 = vmatprep.mubr.f32.mxu1 %v36_v22  ;;  %v25_v33 = vld [vmem:[%s2064_s0 + $0x28] sm:$0xff]  ;;  %v27_v37 = vld [vmem:[%s2064_s0 + $0x38] sm:$0xff]  ;;  %v168_v38 = vld [vmem:[%s2063_s1 + $0x3d0] sm:$0xff]  ;;  %v1262_v41 = vpack.c.bf16 %v151_v32, %v150_v31  ;;  %v1232_v42 = vpack.c.bf16 %v137_v36, %v136_v35 }
  0x28   :  { %1249 = vmatprep.subr.bf16.mxu1 %v1248_v56  ;;  %323 = vmatmul.mubr.f32.gmra.mrb[2].mxu0 %v33_v18  ;;  %v169_v39 = vld [vmem:[%s2063_s1 + $0x3d8] sm:$0xff]  ;;  %v120_v43 = vld [vmem:[%s2063_s1 + $0x250] sm:$0xff]  ;;  %v138_v48 = vld [vmem:[%s2063_s1 + $0x2e0] sm:$0xff] }
  0x29   :  { %1219 = vmatpush3.bf16.msra.mxu0 %v1218_v62  ;;  %467 = vmatprep.mubr.f32.mxu0 %v25_v33  ;;  %v121_v44 = vld [vmem:[%s2063_s1 + $0x258] sm:$0xff]  ;;  %v152_v45 = vld [vmem:[%s2063_s1 + $0x350] sm:$0xff]  ;;  %v1264_v46 = vpack.c.bf16 %v169_v39, %v168_v38  ;;  %v139_v49 = vld [vmem:[%s2063_s1 + $0x2e8] sm:$0xff] }
  0x2a   :  { %1221 = vmatprep.subr.bf16.mxu0 %v1220_v0  ;;  %398 = vmatmul.mubr.f32.gmra.mrb[2].mxu1 %v35_v28  ;;  %v153_v47 = vld [vmem:[%s2063_s1 + $0x358] sm:$0xff]  ;;  %v170_v50 = vld [vmem:[%s2063_s1 + $0x3e0] sm:$0xff]  ;;  %v171_v51 = vld [vmem:[%s2063_s1 + $0x3e8] sm:$0xff]  ;;  %v1234_v52 = vpack.c.bf16 %v121_v44, %v120_v43  ;;  %v1236_v54 = vpack.c.bf16 %v139_v49, %v138_v48 }
  0x2b   :  { %1251 = vmatpush3.bf16.msra.mxu1 %v1250_v63  ;;  %542 = vmatprep.mubr.f32.mxu1 %v27_v37  ;;  %v1266_v53 = vpack.c.bf16 %v153_v47, %v152_v45  ;;  %v122_v55 = vld [vmem:[%s2063_s1 + $0x260] sm:$0xff]  ;;  %v123_v56 = vld [vmem:[%s2063_s1 + $0x268] sm:$0xff]  ;;  %v1268_v58 = vpack.c.bf16 %v171_v51, %v170_v50  ;;  %v140_v60 = vld [vmem:[%s2063_s1 + $0x2f0] sm:$0xff] }
  0x2c   :  { %1253 = vmatprep.subr.bf16.mxu1 %v1252_v4  ;;  %v154_v57 = vld [vmem:[%s2063_s1 + $0x360] sm:$0xff]  ;;  %v155_v59 = vld [vmem:[%s2063_s1 + $0x368] sm:$0xff]  ;;  %v141_v61 = vld [vmem:[%s2063_s1 + $0x2f8] sm:$0xff]  ;;  %v1238_v0 = vpack.c.bf16 %v123_v56, %v122_v55 }
  0x2d   :  { %1223 = vmatpush3.bf16.msra.mxu0 %v1222_v10  ;;  %v172_v62 = vld [vmem:[%s2063_s1 + $0x3f0] sm:$0xff]  ;;  %v173_v63 = vld [vmem:[%s2063_s1 + $0x3f8] sm:$0xff]  ;;  %v1270_v1 = vpack.c.bf16 %v155_v59, %v154_v57  ;;  %v1240_v2 = vpack.c.bf16 %v141_v61, %v140_v60  ;;  %v190_v8 = vld [vmem:[%s2063_s1 + $0x480] sm:$0xff] }
  0x2e   :  { %1225 = vmatprep.subr.bf16.mxu0 %v1224_v15  ;;  %v124_v3 = vld [vmem:[%s2063_s1 + $0x270] sm:$0xff]  ;;  %v125_v4 = vld [vmem:[%s2063_s1 + $0x278] sm:$0xff]  ;;  %v1272_v6 = vpack.c.bf16 %v173_v63, %v172_v62  ;;  %v191_v9 = vld [vmem:[%s2063_s1 + $0x488] sm:$0xff] }
  0x2f   :  { %1255 = vmatpush3.bf16.msra.mxu1 %v1254_v14  ;;  %v156_v5 = vld [vmem:[%s2063_s1 + $0x370] sm:$0xff]  ;;  %v157_v7 = vld [vmem:[%s2063_s1 + $0x378] sm:$0xff]  ;;  %v222_v10 = vld [vmem:[%s2063_s1 + $0x580] sm:$0xff]  ;;  %v1242_v12 = vpack.c.bf16 %v125_v4, %v124_v3  ;;  %v1276_v14 = vpack.c.bf16 %v191_v9, %v190_v8 }
  0x30   :  { %1257 = vmatprep.subr.bf16.mxu1 %v1256_v19  ;;  %v223_v11 = vld [vmem:[%s2063_s1 + $0x588] sm:$0xff]  ;;  %v1274_v13 = vpack.c.bf16 %v157_v7, %v156_v5  ;;  %v174_v15 = vld [vmem:[%s2063_s1 + $0x400] sm:$0xff]  ;;  %v26_v21 = vld [vmem:[%s2064_s0 + $0x30] sm:$0xff] }
  0x31   :  { %1227 = vmatpush3.bf16.msra.mxu0 %v1226_v25  ;;  %v175_v16 = vld [vmem:[%s2063_s1 + $0x408] sm:$0xff]  ;;  %v24_v17 = vld [vmem:[%s2064_s0 + $0x20] sm:$0xff]  ;;  %v1308_v18 = vpack.c.bf16 %v223_v11, %v222_v10  ;;  %v192_v22 = vld [vmem:[%s2063_s1 + $0x490] sm:$0xff] }
  0x32   :  { %1229 = vmatprep.subr.bf16.mxu0 %v1228_v30  ;;  %v206_v19 = vld [vmem:[%s2063_s1 + $0x500] sm:$0xff]  ;;  %v207_v20 = vld [vmem:[%s2063_s1 + $0x508] sm:$0xff]  ;;  %v193_v23 = vld [vmem:[%s2063_s1 + $0x498] sm:$0xff]  ;;  %v1278_v24 = vpack.c.bf16 %v175_v16, %v174_v15 }
  0x33   :  { %1259 = vmatpush3.bf16.msra.mxu1 %v1258_v29  ;;  %v38_v25 = vld [vmem:[%s2064_s0 + $0x90] sm:$0xff]  ;;  %v225_v27 = vld [vmem:[%s2063_s1 + $0x598] sm:$0xff]  ;;  %v1310_v28 = vpack.c.bf16 %v207_v20, %v206_v19  ;;  %v1280_v32 = vpack.c.bf16 %v193_v23, %v192_v22  ;;  %v195_v35 = vld [vmem:[%s2063_s1 + $0x4a8] sm:$0xff] }
  0x34   :  { %1261 = vmatprep.subr.bf16.mxu1 %v1260_v34  ;;  %v224_v26 = vld [vmem:[%s2063_s1 + $0x590] sm:$0xff]  ;;  %v177_v30 = vld [vmem:[%s2063_s1 + $0x418] sm:$0xff]  ;;  %v194_v34 = vld [vmem:[%s2063_s1 + $0x4a0] sm:$0xff] }
  0x35   :  { %1231 = vmatpush3.bf16.msra.mxu0 %v1230_v40  ;;  %v176_v29 = vld [vmem:[%s2063_s1 + $0x410] sm:$0xff]  ;;  %v209_v33 = vld [vmem:[%s2063_s1 + $0x518] sm:$0xff]  ;;  %v40_v36 = vld [vmem:[%s2064_s0 + $0xa0] sm:$0xff]  ;;  %v1312_v37 = vpack.c.bf16 %v225_v27, %v224_v26  ;;  %v1284_v44 = vpack.c.bf16 %v195_v35, %v194_v34 }
  0x36   :  { %1233 = vmatprep.subr.bf16.mxu0 %v1232_v42  ;;  %v208_v31 = vld [vmem:[%s2063_s1 + $0x510] sm:$0xff]  ;;  %v226_v38 = vld [vmem:[%s2063_s1 + $0x5a0] sm:$0xff]  ;;  %v227_v39 = vld [vmem:[%s2063_s1 + $0x5a8] sm:$0xff] }
  0x37   :  { %1263 = vmatpush3.bf16.msra.mxu1 %v1262_v41  ;;  %v37_v40 = vld [vmem:[%s2064_s0 + $0x88] sm:$0xff]  ;;  %v1282_v41 = vpack.c.bf16 %v177_v30, %v176_v29  ;;  %v39_v42 = vld [vmem:[%s2064_s0 + $0x98] sm:$0xff]  ;;  %v1314_v43 = vpack.c.bf16 %v209_v33, %v208_v31  ;;  %v178_v45 = vld [vmem:[%s2063_s1 + $0x420] sm:$0xff]  ;;  %v1316_v48 = vpack.c.bf16 %v227_v39, %v226_v38 }
  0x38   :  { %1265 = vmatprep.subr.bf16.mxu1 %v1264_v46  ;;  %v179_v46 = vld [vmem:[%s2063_s1 + $0x428] sm:$0xff]  ;;  %v210_v47 = vld [vmem:[%s2063_s1 + $0x520] sm:$0xff]  ;;  %v196_v50 = vld [vmem:[%s2063_s1 + $0x4b0] sm:$0xff] }
  0x39   :  { %1235 = vmatpush3.bf16.msra.mxu0 %v1234_v52  ;;  %v211_v49 = vld [vmem:[%s2063_s1 + $0x528] sm:$0xff]  ;;  %v197_v51 = vld [vmem:[%s2063_s1 + $0x4b8] sm:$0xff]  ;;  %v228_v52 = vld [vmem:[%s2063_s1 + $0x5b0] sm:$0xff]  ;;  %v1286_v55 = vpack.c.bf16 %v179_v46, %v178_v45 }
  0x3a   :  { %1237 = vmatprep.subr.bf16.mxu0 %v1236_v54  ;;  %v29_v54 = vld [vmem:[%s2064_s0 + $0x48] sm:$0xff]  ;;  %v31_v56 = vld [vmem:[%s2064_s0 + $0x58] sm:$0xff]  ;;  %v1318_v57 = vpack.c.bf16 %v211_v49, %v210_v47  ;;  %v180_v59 = vld [vmem:[%s2063_s1 + $0x430] sm:$0xff] }
  0x3b   :  { %1267 = vmatpush3.bf16.msra.mxu1 %v1266_v53  ;;  %v229_v53 = vld [vmem:[%s2063_s1 + $0x5b8] sm:$0xff]  ;;  %v212_v61 = vld [vmem:[%s2063_s1 + $0x530] sm:$0xff]  ;;  %v231_v3 = vld [vmem:[%s2063_s1 + $0x5c8] sm:$0xff] }
  0x3c   :  { %1269 = vmatprep.subr.bf16.mxu1 %v1268_v58  ;;  %v1288_v58 = vpack.c.bf16 %v197_v51, %v196_v50  ;;  %v181_v60 = vld [vmem:[%s2063_s1 + $0x438] sm:$0xff]  ;;  %v1320_v62 = vpack.c.bf16 %v229_v53, %v228_v52  ;;  %v182_v7 = vld [vmem:[%s2063_s1 + $0x440] sm:$0xff]  ;;  %v183_v8 = vld [vmem:[%s2063_s1 + $0x448] sm:$0xff] }
  0x3d   :  { %1239 = vmatpush3.bf16.msra.mxu0 %v1238_v0  ;;  %v213_v63 = vld [vmem:[%s2063_s1 + $0x538] sm:$0xff]  ;;  %v198_v0 = vld [vmem:[%s2063_s1 + $0x4c0] sm:$0xff]  ;;  %v1290_v4 = vpack.c.bf16 %v181_v60, %v180_v59  ;;  %v215_v11 = vld [vmem:[%s2063_s1 + $0x548] sm:$0xff]  ;;  %v1294_v16 = vpack.c.bf16 %v183_v8, %v182_v7 }
  0x3e   :  { %1241 = vmatprep.subr.bf16.mxu0 %v1240_v2  ;;  %v230_v2 = vld [vmem:[%s2063_s1 + $0x5c0] sm:$0xff]  ;;  %v1322_v5 = vpack.c.bf16 %v213_v63, %v212_v61  ;;  %v233_v15 = vld [vmem:[%s2063_s1 + $0x5d8] sm:$0xff]  ;;  %v184_v19 = vld [vmem:[%s2063_s1 + $0x450] sm:$0xff] }
  0x3f   :  { %1271 = vmatpush3.bf16.msra.mxu1 %v1270_v1  ;;  %v199_v1 = vld [vmem:[%s2063_s1 + $0x4c8] sm:$0xff]  ;;  %v214_v9 = vld [vmem:[%s2063_s1 + $0x540] sm:$0xff]  ;;  %v1324_v10 = vpack.c.bf16 %v231_v3, %v230_v2  ;;  %v185_v20 = vld [vmem:[%s2063_s1 + $0x458] sm:$0xff] }
  0x40   :  { %1273 = vmatprep.subr.bf16.mxu1 %v1272_v6  ;;  %v1292_v6 = vpack.c.bf16 %v199_v1, %v198_v0  ;;  %v217_v23 = vld [vmem:[%s2063_s1 + $0x558] sm:$0xff]  ;;  %v234_v26 = vld [vmem:[%s2063_s1 + $0x5e0] sm:$0xff]  ;;  %v235_v27 = vld [vmem:[%s2063_s1 + $0x5e8] sm:$0xff] }
  0x41   :  { %1243 = vmatpush3.bf16.msra.mxu0 %v1242_v12  ;;  %v200_v12 = vld [vmem:[%s2063_s1 + $0x4d0] sm:$0xff]  ;;  %v186_v31 = vld [vmem:[%s2063_s1 + $0x460] sm:$0xff]  ;;  %v1332_v34 = vpack.c.bf16 %v235_v27, %v234_v26  ;;  %v219_v35 = vld [vmem:[%s2063_s1 + $0x568] sm:$0xff] }
  0x42   :  { %1277 = vmatprep.subr.bf16.mxu0 %v1276_v14  ;;  %v232_v14 = vld [vmem:[%s2063_s1 + $0x5d0] sm:$0xff]  ;;  %v218_v33 = vld [vmem:[%s2063_s1 + $0x560] sm:$0xff]  ;;  %v237_v39 = vld [vmem:[%s2063_s1 + $0x5f8] sm:$0xff] }
  0x43   :  { %1275 = vmatpush3.bf16.msra.mxu1 %v1274_v13  ;;  %v201_v13 = vld [vmem:[%s2063_s1 + $0x4d8] sm:$0xff]  ;;  %v1328_v22 = vpack.c.bf16 %v233_v15, %v232_v14  ;;  %v236_v38 = vld [vmem:[%s2063_s1 + $0x5f0] sm:$0xff]  ;;  %v238_v50 = vld [vmem:[%s2063_s1 + $0x600] sm:$0xff] }
  0x44   :  { %1309 = vmatprep.subr.bf16.mxu1 %v1308_v18  ;;  %468 = vmatmul.mubr.f32.vlgmr.msra.gmra.mrb[4].mxu0 %v24_v17  ;;  %v1326_v17 = vpack.c.bf16 %v215_v11, %v214_v9  ;;  %v1296_v18 = vpack.c.bf16 %v201_v13, %v200_v12  ;;  %v1336_v45 = vpack.c.bf16 %v237_v39, %v236_v38  ;;  %v220_v46 = vld [vmem:[%s2063_s1 + $0x570] sm:$0xff]  ;;  %v221_v47 = vld [vmem:[%s2063_s1 + $0x578] sm:$0xff]  ;;  %v28_v51 = vld [vmem:[%s2064_s0 + $0x40] sm:$0xff] }
  0x45   :  { %1279 = vmatpush3.bf16.msra.mxu0 %v1278_v24  ;;  %472 = vmatprep.mubr.f32.mxu0 %v38_v25  ;;  %v202_v24 = vld [vmem:[%s2063_s1 + $0x4e0] sm:$0xff]  ;;  %v203_v25 = vld [vmem:[%s2063_s1 + $0x4e8] sm:$0xff]  ;;  %v1338_v49 = vpack.c.bf16 %v221_v47, %v220_v46  ;;  %v30_v52 = vld [vmem:[%s2064_s0 + $0x50] sm:$0xff] }
  0x46   :  { %543 = vmatmul.mubr.f32.vlgmr.msra.gmra.mrb[4].mxu1 %v26_v21  ;;  %1281 = vmatprep.subr.bf16.mxu0 %v1280_v32  ;;  %v216_v21 = vld [vmem:[%s2063_s1 + $0x550] sm:$0xff]  ;;  %v1300_v30 = vpack.c.bf16 %v203_v25, %v202_v24  ;;  %v187_v32 = vld [vmem:[%s2063_s1 + $0x468] sm:$0xff]  ;;  %v784_v59 = vld [vmem:[%s2065_s3] sm:$0xff] }
  0x47   :  { %1311 = vmatpush3.bf16.msra.mxu1 %v1310_v28  ;;  %547 = vmatprep.mubr.f32.mxu1 %v40_v36  ;;  %v1298_v28 = vpack.c.bf16 %v185_v20, %v184_v19  ;;  %v1330_v29 = vpack.c.bf16 %v217_v23, %v216_v21  ;;  %v204_v36 = vld [vmem:[%s2063_s1 + $0x4f0] sm:$0xff]  ;;  %v785_v60 = vld [vmem:[%s2065_s3 + $0x8] sm:$0xff]  ;;  %v787_v63 = vld [vmem:[%s2065_s3 + $0x18] sm:$0xff] }
  0x48   :  { %473 = vmatmul.mubr.f32.gmra.mrb[6].mxu0 %v37_v40  ;;  %1313 = vmatprep.subr.bf16.mxu1 %v1312_v37  ;;  %v205_v37 = vld [vmem:[%s2063_s1 + $0x4f8] sm:$0xff]  ;;  %v1302_v40 = vpack.c.bf16 %v187_v32, %v186_v31  ;;  %v42_v53 = vld [vmem:[%s2064_s0 + $0xb0] sm:$0xff]  ;;  %v1340_v61 = vpack.c.bf16 %v785_v60, %v784_v59  ;;  %v889_v2 = vld [vmem:[%s2066_s2] ss:$0 sm:$0xff] }
  0x49   :  { %1283 = vmatpush3.bf16.msra.mxu0 %v1282_v41  ;;  %617 = vmatprep.mubr.f32.mxu0 %v29_v54  ;;  %v1334_v41 = vpack.c.bf16 %v219_v35, %v218_v33  ;;  %v44_v54 = vld [vmem:[%s2064_s0 + $0xc0] sm:$0xff] }
  0x4a   :  { %548 = vmatmul.mubr.f32.gmra.mrb[6].mxu1 %v39_v42  ;;  %1285 = vmatprep.subr.bf16.mxu0 %v1284_v44  ;;  %v1304_v42 = vpack.c.bf16 %v205_v37, %v204_v36  ;;  %v189_v44 = vld [vmem:[%s2063_s1 + $0x478] sm:$0xff] }
  0x4b   :  { %1315 = vmatpush3.bf16.msra.mxu1 %v1314_v43  ;;  %692 = vmatprep.mubr.f32.mxu1 %v31_v56  ;;  %v188_v43 = vld [vmem:[%s2063_s1 + $0x470] sm:$0xff]  ;;  %v43_v56 = vld [vmem:[%s2064_s0 + $0xb8] sm:$0xff] }
  0x4c   :  { %1317 = vmatprep.subr.bf16.mxu1 %v1316_v48  ;;  %v1306_v48 = vpack.c.bf16 %v189_v44, %v188_v43 }
  0x4d   :  { %1287 = vmatpush3.bf16.msra.mxu0 %v1286_v55  ;;  %v41_v55 = vld [vmem:[%s2064_s0 + $0xa8] sm:$0xff] }
  0x4e   :  { %1289 = vmatprep.subr.bf16.mxu0 %v1288_v58  ;;  %v45_v58 = vld [vmem:[%s2064_s0 + $0xc8] sm:$0xff] }
  0x4f   :  { %1319 = vmatpush3.bf16.msra.mxu1 %v1318_v57  ;;  %v32_v57 = vld [vmem:[%s2064_s0 + $0x60] sm:$0xff] }
  0x50   :  { %1321 = vmatprep.subr.bf16.mxu1 %v1320_v62  ;;  %v786_v62 = vld [vmem:[%s2065_s3 + $0x10] sm:$0xff] }
  0x51   :  { %1291 = vmatpush3.bf16.msra.mxu0 %v1290_v4  ;;  %v1344_v0 = vpack.c.bf16 %v787_v63, %v786_v62 }
  0x52   :  { %1293 = vmatprep.subr.bf16.mxu0 %v1292_v6 }
  0x53   :  { %1323 = vmatpush3.bf16.msra.mxu1 %v1322_v5 }
  0x54   :  { %1325 = vmatprep.subr.bf16.mxu1 %v1324_v10 }
  0x55   :  { %1295 = vmatpush3.bf16.msra.mxu0 %v1294_v16 }
  0x56   :  { %1297 = vmatprep.subr.bf16.mxu0 %v1296_v18 }
  0x57   :  { %1327 = vmatpush3.bf16.msra.mxu1 %v1326_v17 }
  0x58   :  { %1329 = vmatprep.subr.bf16.mxu1 %v1328_v22 }
  0x59   :  { %1299 = vmatpush3.bf16.msra.mxu0 %v1298_v28 }
  0x5a   :  { %1301 = vmatprep.subr.bf16.mxu0 %v1300_v30 }
  0x5b   :  { %1331 = vmatpush3.bf16.msra.mxu1 %v1330_v29 }
  0x5c   :  { %1333 = vmatprep.subr.bf16.mxu1 %v1332_v34 }
  0x5d   :  { %1303 = vmatpush3.bf16.msra.mxu0 %v1302_v40 }
  0x5e   :  { %1305 = vmatprep.subr.bf16.mxu0 %v1304_v42 }
  0x5f   :  { %1335 = vmatpush3.bf16.msra.mxu1 %v1334_v41 }
  0x60   :  { %1337 = vmatprep.subr.bf16.mxu1 %v1336_v45 }
  0x61   :  { %1307 = vmatpush3.bf16.msra.mxu0 %v1306_v48 }
  0x62   :  { %1132 = vmatprep.subr.mxu0 %v238_v50 }
  0x63   :  { %1339 = vmatpush3.bf16.msra.mxu1 %v1338_v49 }
  0x64   :  { %618 = vmatmul.mubr.f32.vlgmr.msra.gmra.mrb[8].mxu0 %v28_v51  ;;  %1341 = vmatprep.subr.bf16.mxu1 %v1340_v61 }
  0x65   :  { %1133 = vmatpush3.msra.mxu0 %v238_v50  ;;  %622 = vmatprep.mubr.f32.mxu0 %v42_v53 }
  0x66   :  { %693 = vmatmul.mubr.f32.vlgmr.msra.gmra.mrb[8].mxu1 %v30_v52 }
  0x67   :  { %697 = vmatprep.mubr.f32.mxu1 %v44_v54  ;;  %1343 = vmatpush3.bf16.msra.mxu1 %v1340_v61 }
  0x68   :  { %623 = vmatmul.mubr.f32.gmra.mrb[10].mxu0 %v41_v55  ;;  %1345 = vmatprep.subr.bf16.mxu1 %v1344_v0 }
  0x69   :  { %1134 = vmatprep.mubr.msk.f32.mxu0 %vm246_vm0, %v32_v57 }
  0x6a   :  { %698 = vmatmul.mubr.f32.gmra.mrb[10].mxu1 %v43_v56 }
  0x6b   :  { %1347 = vmatpush3.bf16.msra.mxu1 %v1344_v0 }
  0x6c   :  { %1135 = vmatmul.mubr.msk.f32.vlgmr.msra.gmra.mrb[12].mxu0 %vm246_vm0, %v45_v58  ;;  %v892_v58 = vld [vmem:[%s2067_s4] ss:$0 sm:$0xff] }
  0xf7   :  { %v927_v1 = vpop.f32.mrb[0].mxu0 }
  0xf8   :  { %v928_v3 = vpop.f32.mrb[1].mxu0 }
  0xf9   :  { %v965_v4 = vpop.f32.mrb[0].mxu1  ;;  %v929_v5 = vadd.f32 %v928_v3, %v927_v1 }
  0xfa   :  { %v966_v6 = vpop.f32.mrb[1].mxu1 }
  0xfb   :  { %v967_v7 = vadd.f32 %v966_v6, %v965_v4  ;;  %v320_v8 = vadd.f32 %v929_v5, %v889_v2  ;;  %v930_v10 = vpop.f32.mrb[2].mxu0 }
  0xfc   :  { %v931_v11 = vpop.f32.mrb[3].mxu0 }
  0xfd   :  { %v395_v9 = vadd.f32 %v967_v7, %v320_v8  ;;  %v932_v12 = vadd.f32 %v931_v11, %v930_v10  ;;  %v968_v13 = vpop.f32.mrb[2].mxu1 }
  0xfe   :  { %v969_v15 = vpop.f32.mrb[3].mxu1 }
  0xff   :  { %v325_v14 = vadd.f32 %v932_v12, %v889_v2  ;;  %v970_v16 = vadd.f32 %v969_v15, %v968_v13 }
 0x101   :  { %v400_v17 = vadd.f32 %v970_v16, %v325_v14 }
 0x117   :  { %v1003_v18 = vpop.f32.mrb[4].mxu0 }
 0x118   :  { %v1004_v19 = vpop.f32.mrb[5].mxu0 }
 0x119   :  { %v1041_v20 = vpop.f32.mrb[4].mxu1  ;;  %v1005_v21 = vadd.f32 %v1004_v19, %v1003_v18 }
 0x11a   :  { %v1042_v22 = vpop.f32.mrb[5].mxu1 }
 0x11b   :  { %v1043_v23 = vadd.f32 %v1042_v22, %v1041_v20  ;;  %v470_v24 = vadd.f32 %v1005_v21, %v395_v9  ;;  %v1006_v25 = vpop.f32.mrb[6].mxu0 }
 0x11c   :  { %v1007_v26 = vpop.f32.mrb[7].mxu0 }
 0x11d   :  { %v1044_v27 = vpop.f32.mrb[6].mxu1  ;;  %v545_v28 = vadd.f32 %v1043_v23, %v470_v24  ;;  %v1008_v29 = vadd.f32 %v1007_v26, %v1006_v25 }
 0x11e   :  { %v1045_v30 = vpop.f32.mrb[7].mxu1 }
 0x11f   :  { %v1046_v31 = vadd.f32 %v1045_v30, %v1044_v27  ;;  %v475_v32 = vadd.f32 %v1008_v29, %v400_v17 }
 0x121   :  { %v550_v33 = vadd.f32 %v1046_v31, %v475_v32 }
 0x137   :  { %v1079_v34 = vpop.f32.mrb[8].mxu0 }
 0x138   :  { %v1080_v35 = vpop.f32.mrb[9].mxu0 }
 0x139   :  { %v1117_v36 = vpop.f32.mrb[8].mxu1  ;;  %v1081_v37 = vadd.f32 %v1080_v35, %v1079_v34 }
 0x13a   :  { %v1118_v38 = vpop.f32.mrb[9].mxu1 }
 0x13b   :  { %v1119_v39 = vadd.f32 %v1118_v38, %v1117_v36  ;;  %v620_v40 = vadd.f32 %v1081_v37, %v545_v28  ;;  %v1082_v41 = vpop.f32.mrb[10].mxu0 }
 0x13c   :  { %v1083_v42 = vpop.f32.mrb[11].mxu0 }
 0x13d   :  { %v1120_v43 = vpop.f32.mrb[10].mxu1  ;;  %v1084_v44 = vadd.f32 %v1083_v42, %v1082_v41  ;;  %v695_v46 = vadd.f32 %v1119_v39, %v620_v40 }
 0x13e   :  { %v1121_v45 = vpop.f32.mrb[11].mxu1 }
 0x13f   :  { %v1122_v47 = vadd.f32 %v1121_v45, %v1120_v43  ;;  %v625_v48 = vadd.f32 %v1084_v44, %v550_v33  ;;  %v1136_v49 = vpop.f32.mrb[12].mxu0 }
 0x140   :  { %v769_v50 = vpop.f32.mrb[13].mxu0 }
 0x141   :  { %v700_v51 = vadd.f32 %v1122_v47, %v625_v48  ;;  %v770_v52 = vadd.f32 %v769_v50, %v695_v46 }
 0x143   :  { %v775_v53 = vadd.f32 %v1136_v49, %v700_v51  ;;  %vm778_vm1 = vcmp.gt.f32.partialorder %v770_v52, 0.0  ;;  %v780_v54 = vmul.f32 0.01, %v770_v52 }
 0x145   :  { %vm779_vm3 = vcmp.gt.f32.partialorder %v775_v53, 0.0  ;;  %v781_v55 = vmul.f32 0.01, %v775_v53  ;;  %v782_v56 = vsel %vm778_vm1, %v770_v52, %v780_v54 }
 0x146   :  { %1145 = vmatprep.mubr.msk.f32.mxu1 %vm795_vm2, %v782_v56 }
 0x147   :  { %v783_v57 = vsel %vm779_vm3, %v775_v53, %v781_v55 }
 0x148   :  { %1146 = vmatmul.mubr.msk.f32.vlgmr.msra.gmra.mrb[12].mxu1 %vm795_vm2, %v783_v57 }
 0x21b   :  { %v1147_v59 = vpop.f32.mrb[12].mxu1 }
 0x21c   :  { %v874_v60 = vadd.f32 %v1147_v59, %v892_v58  ;;  %v868_v61 = vpop.f32.mrb[13].mxu1 }
 0x21d   :  { %v869_v62 = vadd.f32 %v892_v58, %v868_v61 }
 0x21e   :  { %vm878_vm4 = vcmp.gt.f32.partialorder %v874_v60, 0.0  ;;  %v880_v63 = vmul.f32 0.01, %v874_v60 }
 0x21f   :  { %vm877_vm5 = vcmp.gt.f32.partialorder %v869_v62, 0.0  ;;  %v879_v0 = vmul.f32 0.01, %v869_v62 }
 0x220   :  { %v882_v1 = vsel %vm878_vm4, %v874_v60, %v880_v63 }
 0x221   :  { %884 = vst.msk [vmem:[%s2068_s5 + $0x8] sm:$0xff] %vm795_vm2, %v882_v1  ;;  %v881_v2 = vsel %vm877_vm5, %v869_v62, %v879_v0 }
 0x222   :  { %883 = vst.msk [vmem:[%s2068_s5] sm:$0xff] %vm795_vm2, %v881_v2 }

</bundles_post_ra>
